<compile_context>
chip_gen: v7x
topology: tpu7x:2x2x1
jax: 0.10.0
libtpu: 0.0.40
codegen_flags: <defaults>
</compile_context>

<pallas_src>
import functools

import jax
import jax.numpy as jnp
import numpy as np
from jax.experimental import pallas as pl
from jax.experimental.pallas import tpu as pltpu

EMB = 300      # GRU input size (embedding dim fixed by the module)
H = 25         # AttentionSummaryNetwork.attention_size
G = 128        # one lane-aligned gate slot (both directions packed into it)
HS = 64        # bwd lane offset inside a slot: fwd lanes 0:H, bwd lanes HS:HS+H
NG = 3 * G     # r | z | n gate slots
ROWS = 8       # sublane-padded rows per timestep (rows 0:2B real, rest padding)


def _gru_attention_kernel(x_ref, wih_ref, bx_ref, whh_ref, bhn_ref, h0_ref,
                          out_ref, gates, *, T):
    """Fused bidirectional GRU over two stacked sequences.

    x_ref:   [T*ROWS, EMB] bf16  time-major; rows [t*ROWS+0:B]=seq1, [B:2B]=seq2,
                                 [2B:ROWS]=padding (never read back)
    wih_ref: [EMB, 3G] bf16      per gate slot: fwd cols 0:H, bwd cols HS:HS+H
    bx_ref:  [1, 3G]   f32       bih + bhh_{r,z} folded (bhh_n excluded)
    whh_ref: [G, 3G]   bf16      block-diagonal inside each slot (fwd 0:H, bwd HS:HS+H)
    bhn_ref: [1, G]    f32       bhh_n (fwd lanes 0:H, bwd lanes HS:HS+H)
    h0_ref:  [1, G]    f32       learned initial hidden (fwd | bwd)
    out_ref: [T*ROWS, 2G] f32    lanes 0:G  = h copy written by the fwd direction at t
                                 lanes G:2G = h copy written by the bwd direction at t
                                 (wrapper reads only lanes 0:H and G+HS:G+HS+H)
    gates:   [T*ROWS, 3G] f32    VMEM scratch for the precomputed input projection
    """
    # 1) Input projection for every timestep / sequence / direction in one MXU
    #    matmul (bf16 operands, f32 accumulation); linear biases already folded in.
    gates[...] = (jnp.dot(x_ref[...], wih_ref[...],
                          preferred_element_type=jnp.float32) + bx_ref[...])

    bhn = bhn_ref[...]                                     # [1, G]
    h = jnp.broadcast_to(h0_ref[...], (ROWS, G))           # [8, 128] f32
    # Lower half of every 128-lane gate slot = forward direction (built ONCE).
    fwd_half = (jax.lax.broadcasted_iota(jnp.int32, (ROWS, NG), 1) % G) < HS

    # 2) ONE fused recurrence covering {seq1, seq2} x {fwd, bwd}.  T is small and
    #    static, so the loop is fully unrolled and every slice start is an aligned
    #    compile-time constant (multiples of 8 rows / 128 lanes).
    # TODO(synk): if T ever becomes large/dynamic, switch to lax.fori_loop(unroll=2..4)
    # and fold the projection into the loop (drops the `gates` scratch / VMEM ceiling).
    for i in range(T):
        rf = i * ROWS                 # gate row-block consumed by the fwd direction
        rb = (T - 1 - i) * ROWS       # gate row-block consumed by the bwd direction

        gh = jnp.dot(h.astype(jnp.bfloat16), whh_ref[...],
                     preferred_element_type=jnp.float32)             # [8, 3G]
        # fwd half-slots from timestep i, bwd half-slots from timestep T-1-i.
        gx = jnp.where(fwd_half,
                       gates[pl.ds(rf, ROWS), :],
                       gates[pl.ds(rb, ROWS), :])                     # [8, 3G]

        # PyTorch GRU gate order (r, z, n); bhh_n multiplied by r, as required.
        r = jax.nn.sigmoid(gx[:, 0:G] + gh[:, 0:G])
        z = jax.nn.sigmoid(gx[:, G:2 * G] + gh[:, G:2 * G])
        n = jnp.tanh(gx[:, 2 * G:3 * G] + r * (gh[:, 2 * G:3 * G] + bhn))
        h = (1.0 - z) * n + z * h

        # Two full (8,128) unmasked, aligned stores of the same h tile; the wrapper
        # reads only the fwd lanes of the first copy / bwd lanes of the second copy,
        # so correctness never depends on pad rows or pad lanes being zero.
        out_ref[pl.ds(rf, ROWS), pl.ds(0, G)] = h
        out_ref[pl.ds(rb, ROWS), pl.ds(G, G)] = h


@functools.lru_cache(maxsize=None)
def _build_pallas_fn(T):
    vmem = pl.BlockSpec(memory_space=pltpu.MemorySpace.VMEM)
    return pl.pallas_call(
        functools.partial(_gru_attention_kernel, T=T),
        out_shape=jax.ShapeDtypeStruct((T * ROWS, 2 * G), jnp.float32),
        in_specs=[vmem] * 6,
        out_specs=vmem,
        scratch_shapes=[pltpu.VMEM((T * ROWS, NG), jnp.float32)],
        # VMEM scaling guard: everything is held resident (no pipelining); at the
        # current shapes total VMEM use is well under 1 MiB.
        # TODO(synk): on v7x, split the two sequences over a ("parallel",) grid to
        # use both TensorCores once T*B is big enough to amortize the extra padding.
        compiler_params=pltpu.CompilerParams(vmem_limit_bytes=32 * 1024 * 1024),
    )


def prepare_fused_params(params):
    """Pad / fuse the frozen weights ONCE at init (hoisted out of the per-call jit).

    Each 128-lane gate slot holds BOTH directions: forward in lanes 0:H, backward
    in lanes HS:HS+H.  Slot order along the 3G axis is (r, z, n) - PyTorch order.
    """
    def slot(vec_f, vec_b):
        s = jnp.zeros(vec_f.shape[:-1] + (G,), jnp.float32)
        s = s.at[..., 0:H].set(vec_f)
        return s.at[..., HS:HS + H].set(vec_b)

    wih, whh, bx = [], [], []
    for g in range(3):                                          # gate: r, z, n
        wih.append(slot(params["wih_f"][:, g * H:(g + 1) * H],
                        params["wih_b"][:, g * H:(g + 1) * H]))           # [EMB, G]
        blk = jnp.zeros((G, G), jnp.float32)
        blk = blk.at[0:H, 0:H].set(params["whh_f"][:, g * H:(g + 1) * H])
        blk = blk.at[HS:HS + H, HS:HS + H].set(params["whh_b"][:, g * H:(g + 1) * H])
        whh.append(blk)                                                    # [G, G]
        # Fold bih (+ bhh for r/z) into the projection bias; bhh_n stays inside r*(.)
        fold = 1.0 if g < 2 else 0.0
        bx.append(slot(params["bih_f"][0, g * H:(g + 1) * H]
                       + fold * params["bhh_f"][0, g * H:(g + 1) * H],
                       params["bih_b"][0, g * H:(g + 1) * H]
                       + fold * params["bhh_b"][0, g * H:(g + 1) * H]))    # [G]
    fused = {
        "emb": params["emb"].astype(jnp.bfloat16),       # bf16 halves gather bytes
        "wih": jnp.concatenate(wih, axis=-1).astype(jnp.bfloat16),        # [EMB, 3G]
        "whh": jnp.concatenate(whh, axis=-1).astype(jnp.bfloat16),        # [G, 3G]
        "bx": jnp.concatenate(bx, axis=-1)[None, :],                      # [1, 3G] f32
        "bhn": slot(params["bhh_f"][0, 2 * H:], params["bhh_b"][0, 2 * H:])[None, :],
        "h0": slot(params["h0"][0], params["h0"][1])[None, :],            # [1, G] f32
    }
    return jax.device_put(fused)


@jax.jit
def attention_read_forward(x1_ids, x2_ids, features, fused):
    """Mirrors AttentionReadNetwork.forward (x1, x2 token ids; features unused)."""
    del features                      # unused in the original forward as well
    B, T = x1_ids.shape
    assert 2 * B <= ROWS, "per-timestep row block assumes 2*batch <= 8"

    # Embedding gather, time-major, row block padded to 8 sublanes:
    # rows 0:B = seq1, B:2B = seq2, 2B:8 = padding (token 0; never read back).
    ids_tm = jnp.concatenate([x1_ids, x2_ids], axis=0).T                  # [T, 2B]
    ids = jnp.zeros((T, ROWS), jnp.int32).at[:, :2 * B].set(ids_tm)
    x = jnp.take(fused["emb"], ids.reshape(T * ROWS), axis=0)             # bf16 rows

    out = _build_pallas_fn(T)(x, fused["wih"], fused["bx"], fused["whh"],
                              fused["bhn"], fused["h0"])

    # Strip row / lane padding, go back to batch-major [B, T, 2H] (tiny tensors).
    out = out.reshape(T, ROWS, 2 * G)
    att = jnp.concatenate([out[:, :2 * B, 0:H],                        # fwd hidden
                           out[:, :2 * B, G + HS:G + HS + H]], -1)     # bwd hidden
    att1 = jnp.transpose(att[:, :B], (1, 0, 2))
    att2 = jnp.transpose(att[:, B:], (1, 0, 2))
    # TODO(synk): torch.dot on 3-D tensors raises in PyTorch; we implement the
    # flattened inner product sum(attention1 * attention2) instead.
    prod = jnp.sum(att1 * att2)
    return att1, att2, prod


# ------------------------- pure-JAX references (for checking) -------------------------
def _gru_dir_ref(x, wih, whh, bih, bhh, h0, reverse, mm_dtype):
    B, T, _ = x.shape
    h = jnp.broadcast_to(h0[None, :], (B, H))
    outs = [None] * T
    ts = range(T - 1, -1, -1) if reverse else range(T)
    for t in ts:
        gx = jnp.dot(x[:, t, :].astype(mm_dtype), wih.astype(mm_dtype),
                     preferred_element_type=jnp.float32) + bih
        gh = jnp.dot(h.astype(mm_dtype), whh.astype(mm_dtype),
                     preferred_element_type=jnp.float32) + bhh
        r = jax.nn.sigmoid(gx[:, 0:H] + gh[:, 0:H])
        z = jax.nn.sigmoid(gx[:, H:2 * H] + gh[:, H:2 * H])
        n = jnp.tanh(gx[:, 2 * H:] + r * gh[:, 2 * H:])
        h = (1.0 - z) * n + z * h
        outs[t] = h
    return jnp.stack(outs, axis=1)     # [B, T, H]


def _reference(x1_ids, x2_ids, params, mm_dtype):
    def bidir(ids):
        x = jnp.take(params["emb"], ids, axis=0)
        fwd = _gru_dir_ref(x, params["wih_f"], params["whh_f"], params["bih_f"][0],
                           params["bhh_f"][0], params["h0"][0], False, mm_dtype)
        bwd = _gru_dir_ref(x, params["wih_b"], params["whh_b"], params["bih_b"][0],
                           params["bhh_b"][0], params["h0"][1], True, mm_dtype)
        return jnp.concatenate([fwd, bwd], axis=-1)
    a1, a2 = bidir(x1_ids), bidir(x2_ids)
    return a1, a2, jnp.sum(a1 * a2)


# ------------------------------------ main ------------------------------------
if __name__ == "__main__":
    VOCAB = 50
    B, T = 2, 8

    key = jax.random.PRNGKey(0)
    ks = jax.random.split(key, 13)
    scale = 1.0 / np.sqrt(H)

    def uni(k, shape):
        return jax.random.uniform(k, shape, jnp.float32, minval=-scale, maxval=scale)

    params = {
        # frozen embedding matrix (embedding_mat in the PyTorch ctor)
        "emb": jax.random.normal(ks[0], (VOCAB, EMB), jnp.float32) * 0.1,
        # GRU weights, stored transposed for x @ W layout; gate order (r, z, n)
        "wih_f": uni(ks[1], (EMB, 3 * H)),
        "whh_f": uni(ks[2], (H, 3 * H)),
        "bih_f": uni(ks[3], (1, 3 * H)),
        "bhh_f": uni(ks[4], (1, 3 * H)),
        "wih_b": uni(ks[5], (EMB, 3 * H)),
        "whh_b": uni(ks[6], (H, 3 * H)),
        "bih_b": uni(ks[7], (1, 3 * H)),
        "bhh_b": uni(ks[8], (1, 3 * H)),
        # the learned initial hidden state `h` ([2, attention_size])
        "h0": jax.random.normal(ks[9], (2, H), jnp.float32),
    }

    x1_ids = jax.random.randint(ks[10], (B, T), 0, VOCAB, dtype=jnp.int32)
    x2_ids = jax.random.randint(ks[11], (B, T), 0, VOCAB, dtype=jnp.int32)
    features = jax.random.normal(ks[12], (B, 4), jnp.float32)  # unused, as in torch

    fused = prepare_fused_params(params)     # hoisted: runs ONCE, not per forward call
    att1, att2, prod = attention_read_forward(x1_ids, x2_ids, features, fused)
    jax.block_until_ready((att1, att2, prod))

    assert att1.shape == (B, T, 2 * H) and att2.shape == (B, T, 2 * H)

    # Tight check against a reference using the SAME bf16 matmul operands: catches
    # layout / indexing / recurrence bugs without hiding behind bf16 slack.
    r1, r2, rprod = _reference(x1_ids, x2_ids, params, jnp.bfloat16)
    assert jnp.allclose(att1, r1, atol=1e-3, rtol=1e-3)
    assert jnp.allclose(att2, r2, atol=1e-3, rtol=1e-3)
    assert jnp.allclose(prod, rprod, atol=1e-2, rtol=1e-3)

    # Looser check against the pure-f32 reference: confirms bf16 operands are OK.
    f1, f2, fprod = _reference(x1_ids, x2_ids, params, jnp.float32)
    assert jnp.allclose(att1, f1, atol=2e-2, rtol=2e-2)
    assert jnp.allclose(att2, f2, atol=2e-2, rtol=2e-2)
    assert jnp.allclose(prod, fprod, atol=0.25, rtol=5e-2)

    print("KERNEL_OK")
</pallas_src>

<mosaic_0001>
module attributes {stable_mosaic.version = 11 : i64} {
  func.func @_gru_attention_kernel(%arg0: memref<64x300xbf16, #tpu.memory_space<vmem>>, %arg1: memref<300x384xbf16, #tpu.memory_space<vmem>>, %arg2: memref<1x384xf32, #tpu.memory_space<vmem>>, %arg3: memref<128x384xbf16, #tpu.memory_space<vmem>>, %arg4: memref<1x128xf32, #tpu.memory_space<vmem>>, %arg5: memref<1x128xf32, #tpu.memory_space<vmem>>, %arg6: memref<64x256xf32, #tpu.memory_space<vmem>>, %arg7: memref<64x384xf32, #tpu.memory_space<vmem>>) attributes {dimension_semantics = [], scalar_prefetch = 0 : i64, scratch_operands = 1 : i64, tpu.core_type = #tpu.core_type<tc>} {
    %c0 = arith.constant 0 : index
    %c0_0 = arith.constant 0 : index
    %0 = vector.load %arg0[%c0, %c0_0] : memref<64x300xbf16, #tpu.memory_space<vmem>>, vector<64x300xbf16>
    %c0_1 = arith.constant 0 : index
    %c0_2 = arith.constant 0 : index
    %1 = vector.load %arg1[%c0_1, %c0_2] : memref<300x384xbf16, #tpu.memory_space<vmem>>, vector<300x384xbf16>
    %cst = arith.constant dense<0.000000e+00> : vector<64x384xf32>
    %2 = tpu.matmul %0, %1, %cst {dimension_numbers = #tpu.dot_dimension_numbers<[1], [0], [0], [1], [0, 0, 1, 1], [], []>} : vector<64x300xbf16>, vector<300x384xbf16>, vector<64x384xf32> -> vector<64x384xf32>
    %c0_3 = arith.constant 0 : index
    %c0_4 = arith.constant 0 : index
    %3 = vector.load %arg2[%c0_3, %c0_4] : memref<1x384xf32, #tpu.memory_space<vmem>>, vector<1x384xf32>
    %4 = vector.broadcast %3 : vector<1x384xf32> to vector<64x384xf32>
    %5 = arith.addf %2, %4 : vector<64x384xf32>
    %c0_5 = arith.constant 0 : index
    %c0_6 = arith.constant 0 : index
    %6 = vector.load %arg7[%c0_5, %c0_6] : memref<64x384xf32, #tpu.memory_space<vmem>>, vector<64x384xf32>
    tpu.vector_store %arg7[%c0_5, %c0_6], %5 {strides = array<i32>} : memref<64x384xf32, #tpu.memory_space<vmem>>, vector<64x384xf32>,
    %c0_7 = arith.constant 0 : index
    %c0_8 = arith.constant 0 : index
    %7 = vector.load %arg4[%c0_7, %c0_8] : memref<1x128xf32, #tpu.memory_space<vmem>>, vector<1x128xf32>
    %c0_9 = arith.constant 0 : index
    %c0_10 = arith.constant 0 : index
    %8 = vector.load %arg5[%c0_9, %c0_10] : memref<1x128xf32, #tpu.memory_space<vmem>>, vector<1x128xf32>
    %9 = vector.shape_cast %8 : vector<1x128xf32> to vector<1x128xf32>
    %10 = vector.broadcast %9 : vector<1x128xf32> to vector<8x128xf32>
    %11 = tpu.iota {dimensions = array<i32: 1>} : vector<8x384xi32>
    %c128_i32 = arith.constant 128 : i32
    %c0_i32 = arith.constant 0 : i32
    %12 = arith.cmpi eq, %c128_i32, %c0_i32 : i32
    %c1_i32 = arith.constant 1 : i32
    %13 = arith.select %12, %c1_i32, %c128_i32 : i32
    %14 = vector.broadcast %13 : i32 to vector<8x384xi32>
    %15 = arith.remsi %11, %14 : vector<8x384xi32>
    %c0_i32_11 = arith.constant 0 : i32
    %16 = vector.broadcast %c0_i32_11 : i32 to vector<8x384xi32>
    %17 = arith.cmpi ne, %15, %16 : vector<8x384xi32>
    %c0_i32_12 = arith.constant 0 : i32
    %18 = vector.broadcast %c0_i32_12 : i32 to vector<8x384xi32>
    %19 = arith.cmpi slt, %15, %18 : vector<8x384xi32>
    %c0_i32_13 = arith.constant 0 : i32
    %20 = arith.cmpi slt, %13, %c0_i32_13 : i32
    %21 = vector.broadcast %20 : i1 to vector<8x384xi1>
    %22 = vector.broadcast %21 : vector<8x384xi1> to vector<8x384xi1>
    %23 = arith.xori %19, %22 : vector<8x384xi1>
    %24 = arith.andi %23, %17 : vector<8x384xi1>
    %25 = vector.broadcast %13 : i32 to vector<8x384xi32>
    %26 = arith.addi %15, %25 : vector<8x384xi32>
    %27 = arith.select %24, %26, %15 : vector<8x384xi1>, vector<8x384xi32>
    %c64_i32 = arith.constant 64 : i32
    %28 = vector.broadcast %c64_i32 : i32 to vector<8x384xi32>
    %29 = arith.cmpi slt, %27, %28 : vector<8x384xi32>
    %30 = arith.truncf %10 : vector<8x128xf32> to vector<8x128xbf16>
    %c0_14 = arith.constant 0 : index
    %c0_15 = arith.constant 0 : index
    %31 = vector.load %arg3[%c0_14, %c0_15] : memref<128x384xbf16, #tpu.memory_space<vmem>>, vector<128x384xbf16>
    %cst_16 = arith.constant dense<0.000000e+00> : vector<8x384xf32>
    %32 = tpu.matmul %30, %31, %cst_16 {dimension_numbers = #tpu.dot_dimension_numbers<[1], [0], [0], [1], [0, 0, 1, 1], [], []>} : vector<8x128xbf16>, vector<128x384xbf16>, vector<8x384xf32> -> vector<8x384xf32>
    %c0_17 = arith.constant 0 : index
    %c0_18 = arith.constant 0 : index
    %33 = vector.load %arg7[%c0_17, %c0_18] : memref<64x384xf32, #tpu.memory_space<vmem>>, vector<8x384xf32>
    %c56 = arith.constant 56 : index
    %c0_19 = arith.constant 0 : index
    %34 = vector.load %arg7[%c56, %c0_19] : memref<64x384xf32, #tpu.memory_space<vmem>>, vector<8x384xf32>
    %35 = arith.select %29, %33, %34 : vector<8x384xi1>, vector<8x384xf32>
    %36 = vector.extract_strided_slice %35 {offsets = [0, 0], sizes = [8, 128], strides = [1, 1]} : vector<8x384xf32> to vector<8x128xf32>
    %37 = vector.extract_strided_slice %32 {offsets = [0, 0], sizes = [8, 128], strides = [1, 1]} : vector<8x384xf32> to vector<8x128xf32>
    %38 = arith.addf %36, %37 : vector<8x128xf32>
    %39 = arith.negf %38 : vector<8x128xf32>
    %40 = math.exp %39 : vector<8x128xf32>
    %cst_20 = arith.constant 1.000000e+00 : f32
    %41 = vector.broadcast %cst_20 : f32 to vector<8x128xf32>
    %42 = arith.addf %41, %40 : vector<8x128xf32>
    %43 = arith.divf %41, %42 : vector<8x128xf32>
    %44 = vector.extract_strided_slice %35 {offsets = [0, 128], sizes = [8, 128], strides = [1, 1]} : vector<8x384xf32> to vector<8x128xf32>
    %45 = vector.extract_strided_slice %32 {offsets = [0, 128], sizes = [8, 128], strides = [1, 1]} : vector<8x384xf32> to vector<8x128xf32>
    %46 = arith.addf %44, %45 : vector<8x128xf32>
    %47 = arith.negf %46 : vector<8x128xf32>
    %48 = math.exp %47 : vector<8x128xf32>
    %cst_21 = arith.constant 1.000000e+00 : f32
    %49 = vector.broadcast %cst_21 : f32 to vector<8x128xf32>
    %50 = arith.addf %49, %48 : vector<8x128xf32>
    %51 = arith.divf %49, %50 : vector<8x128xf32>
    %52 = vector.extract_strided_slice %35 {offsets = [0, 256], sizes = [8, 128], strides = [1, 1]} : vector<8x384xf32> to vector<8x128xf32>
    %53 = vector.extract_strided_slice %32 {offsets = [0, 256], sizes = [8, 128], strides = [1, 1]} : vector<8x384xf32> to vector<8x128xf32>
    %54 = vector.broadcast %7 : vector<1x128xf32> to vector<8x128xf32>
    %55 = arith.addf %53, %54 : vector<8x128xf32>
    %56 = arith.mulf %43, %55 : vector<8x128xf32>
    %57 = arith.addf %52, %56 : vector<8x128xf32>
    %58 = math.tanh %57 : vector<8x128xf32>
    %cst_22 = arith.constant 1.000000e+00 : f32
    %59 = vector.broadcast %cst_22 : f32 to vector<8x128xf32>
    %60 = arith.subf %59, %51 : vector<8x128xf32>
    %61 = arith.mulf %60, %58 : vector<8x128xf32>
    %62 = arith.mulf %51, %10 : vector<8x128xf32>
    %63 = arith.addf %61, %62 : vector<8x128xf32>
    %c0_23 = arith.constant 0 : index
    %c0_24 = arith.constant 0 : index
    %64 = vector.load %arg6[%c0_23, %c0_24] : memref<64x256xf32, #tpu.memory_space<vmem>>, vector<8x128xf32>
    tpu.vector_store %arg6[%c0_23, %c0_24], %63 {strides = array<i32>} : memref<64x256xf32, #tpu.memory_space<vmem>>, vector<8x128xf32>,
    %c56_25 = arith.constant 56 : index
    %c128 = arith.constant 128 : index
    %65 = vector.load %arg6[%c56_25, %c128] : memref<64x256xf32, #tpu.memory_space<vmem>>, vector<8x128xf32>
    tpu.vector_store %arg6[%c56_25, %c128], %63 {strides = array<i32>} : memref<64x256xf32, #tpu.memory_space<vmem>>, vector<8x128xf32>,
    %66 = arith.truncf %63 : vector<8x128xf32> to vector<8x128xbf16>
    %c0_26 = arith.constant 0 : index
    %c0_27 = arith.constant 0 : index
    %67 = vector.load %arg3[%c0_26, %c0_27] : memref<128x384xbf16, #tpu.memory_space<vmem>>, vector<128x384xbf16>
    %cst_28 = arith.constant dense<0.000000e+00> : vector<8x384xf32>
    %68 = tpu.matmul %66, %67, %cst_28 {dimension_numbers = #tpu.dot_dimension_numbers<[1], [0], [0], [1], [0, 0, 1, 1], [], []>} : vector<8x128xbf16>, vector<128x384xbf16>, vector<8x384xf32> -> vector<8x384xf32>
    %c8 = arith.constant 8 : index
    %c0_29 = arith.constant 0 : index
    %69 = vector.load %arg7[%c8, %c0_29] : memref<64x384xf32, #tpu.memory_space<vmem>>, vector<8x384xf32>
    %c48 = arith.constant 48 : index
    %c0_30 = arith.constant 0 : index
    %70 = vector.load %arg7[%c48, %c0_30] : memref<64x384xf32, #tpu.memory_space<vmem>>, vector<8x384xf32>
    %71 = arith.select %29, %69, %70 : vector<8x384xi1>, vector<8x384xf32>
    %72 = vector.extract_strided_slice %71 {offsets = [0, 0], sizes = [8, 128], strides = [1, 1]} : vector<8x384xf32> to vector<8x128xf32>
    %73 = vector.extract_strided_slice %68 {offsets = [0, 0], sizes = [8, 128], strides = [1, 1]} : vector<8x384xf32> to vector<8x128xf32>
    %74 = arith.addf %72, %73 : vector<8x128xf32>
    %75 = arith.negf %74 : vector<8x128xf32>
    %76 = math.exp %75 : vector<8x128xf32>
    %cst_31 = arith.constant 1.000000e+00 : f32
    %77 = vector.broadcast %cst_31 : f32 to vector<8x128xf32>
    %78 = arith.addf %77, %76 : vector<8x128xf32>
    %79 = arith.divf %77, %78 : vector<8x128xf32>
    %80 = vector.extract_strided_slice %71 {offsets = [0, 128], sizes = [8, 128], strides = [1, 1]} : vector<8x384xf32> to vector<8x128xf32>
    %81 = vector.extract_strided_slice %68 {offsets = [0, 128], sizes = [8, 128], strides = [1, 1]} : vector<8x384xf32> to vector<8x128xf32>
    %82 = arith.addf %80, %81 : vector<8x128xf32>
    %83 = arith.negf %82 : vector<8x128xf32>
    %84 = math.exp %83 : vector<8x128xf32>
    %cst_32 = arith.constant 1.000000e+00 : f32
    %85 = vector.broadcast %cst_32 : f32 to vector<8x128xf32>
    %86 = arith.addf %85, %84 : vector<8x128xf32>
    %87 = arith.divf %85, %86 : vector<8x128xf32>
    %88 = vector.extract_strided_slice %71 {offsets = [0, 256], sizes = [8, 128], strides = [1, 1]} : vector<8x384xf32> to vector<8x128xf32>
    %89 = vector.extract_strided_slice %68 {offsets = [0, 256], sizes = [8, 128], strides = [1, 1]} : vector<8x384xf32> to vector<8x128xf32>
    %90 = vector.broadcast %7 : vector<1x128xf32> to vector<8x128xf32>
    %91 = arith.addf %89, %90 : vector<8x128xf32>
    %92 = arith.mulf %79, %91 : vector<8x128xf32>
    %93 = arith.addf %88, %92 : vector<8x128xf32>
    %94 = math.tanh %93 : vector<8x128xf32>
    %cst_33 = arith.constant 1.000000e+00 : f32
    %95 = vector.broadcast %cst_33 : f32 to vector<8x128xf32>
    %96 = arith.subf %95, %87 : vector<8x128xf32>
    %97 = arith.mulf %96, %94 : vector<8x128xf32>
    %98 = arith.mulf %87, %63 : vector<8x128xf32>
    %99 = arith.addf %97, %98 : vector<8x128xf32>
    %c8_34 = arith.constant 8 : index
    %c0_35 = arith.constant 0 : index
    %100 = vector.load %arg6[%c8_34, %c0_35] : memref<64x256xf32, #tpu.memory_space<vmem>>, vector<8x128xf32>
    tpu.vector_store %arg6[%c8_34, %c0_35], %99 {strides = array<i32>} : memref<64x256xf32, #tpu.memory_space<vmem>>, vector<8x128xf32>,
    %c48_36 = arith.constant 48 : index
    %c128_37 = arith.constant 128 : index
    %101 = vector.load %arg6[%c48_36, %c128_37] : memref<64x256xf32, #tpu.memory_space<vmem>>, vector<8x128xf32>
    tpu.vector_store %arg6[%c48_36, %c128_37], %99 {strides = array<i32>} : memref<64x256xf32, #tpu.memory_space<vmem>>, vector<8x128xf32>,
    %102 = arith.truncf %99 : vector<8x128xf32> to vector<8x128xbf16>
    %c0_38 = arith.constant 0 : index
    %c0_39 = arith.constant 0 : index
    %103 = vector.load %arg3[%c0_38, %c0_39] : memref<128x384xbf16, #tpu.memory_space<vmem>>, vector<128x384xbf16>
    %cst_40 = arith.constant dense<0.000000e+00> : vector<8x384xf32>
    %104 = tpu.matmul %102, %103, %cst_40 {dimension_numbers = #tpu.dot_dimension_numbers<[1], [0], [0], [1], [0, 0, 1, 1], [], []>} : vector<8x128xbf16>, vector<128x384xbf16>, vector<8x384xf32> -> vector<8x384xf32>
    %c16 = arith.constant 16 : index
    %c0_41 = arith.constant 0 : index
    %105 = vector.load %arg7[%c16, %c0_41] : memref<64x384xf32, #tpu.memory_space<vmem>>, vector<8x384xf32>
    %c40 = arith.constant 40 : index
    %c0_42 = arith.constant 0 : index
    %106 = vector.load %arg7[%c40, %c0_42] : memref<64x384xf32, #tpu.memory_space<vmem>>, vector<8x384xf32>
    %107 = arith.select %29, %105, %106 : vector<8x384xi1>, vector<8x384xf32>
    %108 = vector.extract_strided_slice %107 {offsets = [0, 0], sizes = [8, 128], strides = [1, 1]} : vector<8x384xf32> to vector<8x128xf32>
    %109 = vector.extract_strided_slice %104 {offsets = [0, 0], sizes = [8, 128], strides = [1, 1]} : vector<8x384xf32> to vector<8x128xf32>
    %110 = arith.addf %108, %109 : vector<8x128xf32>
    %111 = arith.negf %110 : vector<8x128xf32>
    %112 = math.exp %111 : vector<8x128xf32>
    %cst_43 = arith.constant 1.000000e+00 : f32
    %113 = vector.broadcast %cst_43 : f32 to vector<8x128xf32>
    %114 = arith.addf %113, %112 : vector<8x128xf32>
    %115 = arith.divf %113, %114 : vector<8x128xf32>
    %116 = vector.extract_strided_slice %107 {offsets = [0, 128], sizes = [8, 128], strides = [1, 1]} : vector<8x384xf32> to vector<8x128xf32>
    %117 = vector.extract_strided_slice %104 {offsets = [0, 128], sizes = [8, 128], strides = [1, 1]} : vector<8x384xf32> to vector<8x128xf32>
    %118 = arith.addf %116, %117 : vector<8x128xf32>
    %119 = arith.negf %118 : vector<8x128xf32>
    %120 = math.exp %119 : vector<8x128xf32>
    %cst_44 = arith.constant 1.000000e+00 : f32
    %121 = vector.broadcast %cst_44 : f32 to vector<8x128xf32>
    %122 = arith.addf %121, %120 : vector<8x128xf32>
    %123 = arith.divf %121, %122 : vector<8x128xf32>
    %124 = vector.extract_strided_slice %107 {offsets = [0, 256], sizes = [8, 128], strides = [1, 1]} : vector<8x384xf32> to vector<8x128xf32>
    %125 = vector.extract_strided_slice %104 {offsets = [0, 256], sizes = [8, 128], strides = [1, 1]} : vector<8x384xf32> to vector<8x128xf32>
    %126 = vector.broadcast %7 : vector<1x128xf32> to vector<8x128xf32>
    %127 = arith.addf %125, %126 : vector<8x128xf32>
    %128 = arith.mulf %115, %127 : vector<8x128xf32>
    %129 = arith.addf %124, %128 : vector<8x128xf32>
    %130 = math.tanh %129 : vector<8x128xf32>
    %cst_45 = arith.constant 1.000000e+00 : f32
    %131 = vector.broadcast %cst_45 : f32 to vector<8x128xf32>
    %132 = arith.subf %131, %123 : vector<8x128xf32>
    %133 = arith.mulf %132, %130 : vector<8x128xf32>
    %134 = arith.mulf %123, %99 : vector<8x128xf32>
    %135 = arith.addf %133, %134 : vector<8x128xf32>
    %c16_46 = arith.constant 16 : index
    %c0_47 = arith.constant 0 : index
    %136 = vector.load %arg6[%c16_46, %c0_47] : memref<64x256xf32, #tpu.memory_space<vmem>>, vector<8x128xf32>
    tpu.vector_store %arg6[%c16_46, %c0_47], %135 {strides = array<i32>} : memref<64x256xf32, #tpu.memory_space<vmem>>, vector<8x128xf32>,
    %c40_48 = arith.constant 40 : index
    %c128_49 = arith.constant 128 : index
    %137 = vector.load %arg6[%c40_48, %c128_49] : memref<64x256xf32, #tpu.memory_space<vmem>>, vector<8x128xf32>
    tpu.vector_store %arg6[%c40_48, %c128_49], %135 {strides = array<i32>} : memref<64x256xf32, #tpu.memory_space<vmem>>, vector<8x128xf32>,
    %138 = arith.truncf %135 : vector<8x128xf32> to vector<8x128xbf16>
    %c0_50 = arith.constant 0 : index
    %c0_51 = arith.constant 0 : index
    %139 = vector.load %arg3[%c0_50, %c0_51] : memref<128x384xbf16, #tpu.memory_space<vmem>>, vector<128x384xbf16>
    %cst_52 = arith.constant dense<0.000000e+00> : vector<8x384xf32>
    %140 = tpu.matmul %138, %139, %cst_52 {dimension_numbers = #tpu.dot_dimension_numbers<[1], [0], [0], [1], [0, 0, 1, 1], [], []>} : vector<8x128xbf16>, vector<128x384xbf16>, vector<8x384xf32> -> vector<8x384xf32>
    %c24 = arith.constant 24 : index
    %c0_53 = arith.constant 0 : index
    %141 = vector.load %arg7[%c24, %c0_53] : memref<64x384xf32, #tpu.memory_space<vmem>>, vector<8x384xf32>
    %c32 = arith.constant 32 : index
    %c0_54 = arith.constant 0 : index
    %142 = vector.load %arg7[%c32, %c0_54] : memref<64x384xf32, #tpu.memory_space<vmem>>, vector<8x384xf32>
    %143 = arith.select %29, %141, %142 : vector<8x384xi1>, vector<8x384xf32>
    %144 = vector.extract_strided_slice %143 {offsets = [0, 0], sizes = [8, 128], strides = [1, 1]} : vector<8x384xf32> to vector<8x128xf32>
    %145 = vector.extract_strided_slice %140 {offsets = [0, 0], sizes = [8, 128], strides = [1, 1]} : vector<8x384xf32> to vector<8x128xf32>
    %146 = arith.addf %144, %145 : vector<8x128xf32>
    %147 = arith.negf %146 : vector<8x128xf32>
    %148 = math.exp %147 : vector<8x128xf32>
    %cst_55 = arith.constant 1.000000e+00 : f32
    %149 = vector.broadcast %cst_55 : f32 to vector<8x128xf32>
    %150 = arith.addf %149, %148 : vector<8x128xf32>
    %151 = arith.divf %149, %150 : vector<8x128xf32>
    %152 = vector.extract_strided_slice %143 {offsets = [0, 128], sizes = [8, 128], strides = [1, 1]} : vector<8x384xf32> to vector<8x128xf32>
    %153 = vector.extract_strided_slice %140 {offsets = [0, 128], sizes = [8, 128], strides = [1, 1]} : vector<8x384xf32> to vector<8x128xf32>
    %154 = arith.addf %152, %153 : vector<8x128xf32>
    %155 = arith.negf %154 : vector<8x128xf32>
    %156 = math.exp %155 : vector<8x128xf32>
    %cst_56 = arith.constant 1.000000e+00 : f32
    %157 = vector.broadcast %cst_56 : f32 to vector<8x128xf32>
    %158 = arith.addf %157, %156 : vector<8x128xf32>
    %159 = arith.divf %157, %158 : vector<8x128xf32>
    %160 = vector.extract_strided_slice %143 {offsets = [0, 256], sizes = [8, 128], strides = [1, 1]} : vector<8x384xf32> to vector<8x128xf32>
    %161 = vector.extract_strided_slice %140 {offsets = [0, 256], sizes = [8, 128], strides = [1, 1]} : vector<8x384xf32> to vector<8x128xf32>
    %162 = vector.broadcast %7 : vector<1x128xf32> to vector<8x128xf32>
    %163 = arith.addf %161, %162 : vector<8x128xf32>
    %164 = arith.mulf %151, %163 : vector<8x128xf32>
    %165 = arith.addf %160, %164 : vector<8x128xf32>
    %166 = math.tanh %165 : vector<8x128xf32>
    %cst_57 = arith.constant 1.000000e+00 : f32
    %167 = vector.broadcast %cst_57 : f32 to vector<8x128xf32>
    %168 = arith.subf %167, %159 : vector<8x128xf32>
    %169 = arith.mulf %168, %166 : vector<8x128xf32>
    %170 = arith.mulf %159, %135 : vector<8x128xf32>
    %171 = arith.addf %169, %170 : vector<8x128xf32>
    %c24_58 = arith.constant 24 : index
    %c0_59 = arith.constant 0 : index
    %172 = vector.load %arg6[%c24_58, %c0_59] : memref<64x256xf32, #tpu.memory_space<vmem>>, vector<8x128xf32>
    tpu.vector_store %arg6[%c24_58, %c0_59], %171 {strides = array<i32>} : memref<64x256xf32, #tpu.memory_space<vmem>>, vector<8x128xf32>,
    %c32_60 = arith.constant 32 : index
    %c128_61 = arith.constant 128 : index
    %173 = vector.load %arg6[%c32_60, %c128_61] : memref<64x256xf32, #tpu.memory_space<vmem>>, vector<8x128xf32>
    tpu.vector_store %arg6[%c32_60, %c128_61], %171 {strides = array<i32>} : memref<64x256xf32, #tpu.memory_space<vmem>>, vector<8x128xf32>,
    %174 = arith.truncf %171 : vector<8x128xf32> to vector<8x128xbf16>
    %c0_62 = arith.constant 0 : index
    %c0_63 = arith.constant 0 : index
    %175 = vector.load %arg3[%c0_62, %c0_63] : memref<128x384xbf16, #tpu.memory_space<vmem>>, vector<128x384xbf16>
    %cst_64 = arith.constant dense<0.000000e+00> : vector<8x384xf32>
    %176 = tpu.matmul %174, %175, %cst_64 {dimension_numbers = #tpu.dot_dimension_numbers<[1], [0], [0], [1], [0, 0, 1, 1], [], []>} : vector<8x128xbf16>, vector<128x384xbf16>, vector<8x384xf32> -> vector<8x384xf32>
    %c32_65 = arith.constant 32 : index
    %c0_66 = arith.constant 0 : index
    %177 = vector.load %arg7[%c32_65, %c0_66] : memref<64x384xf32, #tpu.memory_space<vmem>>, vector<8x384xf32>
    %c24_67 = arith.constant 24 : index
    %c0_68 = arith.constant 0 : index
    %178 = vector.load %arg7[%c24_67, %c0_68] : memref<64x384xf32, #tpu.memory_space<vmem>>, vector<8x384xf32>
    %179 = arith.select %29, %177, %178 : vector<8x384xi1>, vector<8x384xf32>
    %180 = vector.extract_strided_slice %179 {offsets = [0, 0], sizes = [8, 128], strides = [1, 1]} : vector<8x384xf32> to vector<8x128xf32>
    %181 = vector.extract_strided_slice %176 {offsets = [0, 0], sizes = [8, 128], strides = [1, 1]} : vector<8x384xf32> to vector<8x128xf32>
    %182 = arith.addf %180, %181 : vector<8x128xf32>
    %183 = arith.negf %182 : vector<8x128xf32>
    %184 = math.exp %183 : vector<8x128xf32>
    %cst_69 = arith.constant 1.000000e+00 : f32
    %185 = vector.broadcast %cst_69 : f32 to vector<8x128xf32>
    %186 = arith.addf %185, %184 : vector<8x128xf32>
    %187 = arith.divf %185, %186 : vector<8x128xf32>
    %188 = vector.extract_strided_slice %179 {offsets = [0, 128], sizes = [8, 128], strides = [1, 1]} : vector<8x384xf32> to vector<8x128xf32>
    %189 = vector.extract_strided_slice %176 {offsets = [0, 128], sizes = [8, 128], strides = [1, 1]} : vector<8x384xf32> to vector<8x128xf32>
    %190 = arith.addf %188, %189 : vector<8x128xf32>
    %191 = arith.negf %190 : vector<8x128xf32>
    %192 = math.exp %191 : vector<8x128xf32>
    %cst_70 = arith.constant 1.000000e+00 : f32
    %193 = vector.broadcast %cst_70 : f32 to vector<8x128xf32>
    %194 = arith.addf %193, %192 : vector<8x128xf32>
    %195 = arith.divf %193, %194 : vector<8x128xf32>
    %196 = vector.extract_strided_slice %179 {offsets = [0, 256], sizes = [8, 128], strides = [1, 1]} : vector<8x384xf32> to vector<8x128xf32>
    %197 = vector.extract_strided_slice %176 {offsets = [0, 256], sizes = [8, 128], strides = [1, 1]} : vector<8x384xf32> to vector<8x128xf32>
    %198 = vector.broadcast %7 : vector<1x128xf32> to vector<8x128xf32>
    %199 = arith.addf %197, %198 : vector<8x128xf32>
    %200 = arith.mulf %187, %199 : vector<8x128xf32>
    %201 = arith.addf %196, %200 : vector<8x128xf32>
    %202 = math.tanh %201 : vector<8x128xf32>
    %cst_71 = arith.constant 1.000000e+00 : f32
    %203 = vector.broadcast %cst_71 : f32 to vector<8x128xf32>
    %204 = arith.subf %203, %195 : vector<8x128xf32>
    %205 = arith.mulf %204, %202 : vector<8x128xf32>
    %206 = arith.mulf %195, %171 : vector<8x128xf32>
    %207 = arith.addf %205, %206 : vector<8x128xf32>
    %c32_72 = arith.constant 32 : index
    %c0_73 = arith.constant 0 : index
    %208 = vector.load %arg6[%c32_72, %c0_73] : memref<64x256xf32, #tpu.memory_space<vmem>>, vector<8x128xf32>
    tpu.vector_store %arg6[%c32_72, %c0_73], %207 {strides = array<i32>} : memref<64x256xf32, #tpu.memory_space<vmem>>, vector<8x128xf32>,
    %c24_74 = arith.constant 24 : index
    %c128_75 = arith.constant 128 : index
    %209 = vector.load %arg6[%c24_74, %c128_75] : memref<64x256xf32, #tpu.memory_space<vmem>>, vector<8x128xf32>
    tpu.vector_store %arg6[%c24_74, %c128_75], %207 {strides = array<i32>} : memref<64x256xf32, #tpu.memory_space<vmem>>, vector<8x128xf32>,
    %210 = arith.truncf %207 : vector<8x128xf32> to vector<8x128xbf16>
    %c0_76 = arith.constant 0 : index
    %c0_77 = arith.constant 0 : index
    %211 = vector.load %arg3[%c0_76, %c0_77] : memref<128x384xbf16, #tpu.memory_space<vmem>>, vector<128x384xbf16>
    %cst_78 = arith.constant dense<0.000000e+00> : vector<8x384xf32>
    %212 = tpu.matmul %210, %211, %cst_78 {dimension_numbers = #tpu.dot_dimension_numbers<[1], [0], [0], [1], [0, 0, 1, 1], [], []>} : vector<8x128xbf16>, vector<128x384xbf16>, vector<8x384xf32> -> vector<8x384xf32>
    %c40_79 = arith.constant 40 : index
    %c0_80 = arith.constant 0 : index
    %213 = vector.load %arg7[%c40_79, %c0_80] : memref<64x384xf32, #tpu.memory_space<vmem>>, vector<8x384xf32>
    %c16_81 = arith.constant 16 : index
    %c0_82 = arith.constant 0 : index
    %214 = vector.load %arg7[%c16_81, %c0_82] : memref<64x384xf32, #tpu.memory_space<vmem>>, vector<8x384xf32>
    %215 = arith.select %29, %213, %214 : vector<8x384xi1>, vector<8x384xf32>
    %216 = vector.extract_strided_slice %215 {offsets = [0, 0], sizes = [8, 128], strides = [1, 1]} : vector<8x384xf32> to vector<8x128xf32>
    %217 = vector.extract_strided_slice %212 {offsets = [0, 0], sizes = [8, 128], strides = [1, 1]} : vector<8x384xf32> to vector<8x128xf32>
    %218 = arith.addf %216, %217 : vector<8x128xf32>
    %219 = arith.negf %218 : vector<8x128xf32>
    %220 = math.exp %219 : vector<8x128xf32>
    %cst_83 = arith.constant 1.000000e+00 : f32
    %221 = vector.broadcast %cst_83 : f32 to vector<8x128xf32>
    %222 = arith.addf %221, %220 : vector<8x128xf32>
    %223 = arith.divf %221, %222 : vector<8x128xf32>
    %224 = vector.extract_strided_slice %215 {offsets = [0, 128], sizes = [8, 128], strides = [1, 1]} : vector<8x384xf32> to vector<8x128xf32>
    %225 = vector.extract_strided_slice %212 {offsets = [0, 128], sizes = [8, 128], strides = [1, 1]} : vector<8x384xf32> to vector<8x128xf32>
    %226 = arith.addf %224, %225 : vector<8x128xf32>
    %227 = arith.negf %226 : vector<8x128xf32>
    %228 = math.exp %227 : vector<8x128xf32>
    %cst_84 = arith.constant 1.000000e+00 : f32
    %229 = vector.broadcast %cst_84 : f32 to vector<8x128xf32>
    %230 = arith.addf %229, %228 : vector<8x128xf32>
    %231 = arith.divf %229, %230 : vector<8x128xf32>
    %232 = vector.extract_strided_slice %215 {offsets = [0, 256], sizes = [8, 128], strides = [1, 1]} : vector<8x384xf32> to vector<8x128xf32>
    %233 = vector.extract_strided_slice %212 {offsets = [0, 256], sizes = [8, 128], strides = [1, 1]} : vector<8x384xf32> to vector<8x128xf32>
    %234 = vector.broadcast %7 : vector<1x128xf32> to vector<8x128xf32>
    %235 = arith.addf %233, %234 : vector<8x128xf32>
    %236 = arith.mulf %223, %235 : vector<8x128xf32>
    %237 = arith.addf %232, %236 : vector<8x128xf32>
    %238 = math.tanh %237 : vector<8x128xf32>
    %cst_85 = arith.constant 1.000000e+00 : f32
    %239 = vector.broadcast %cst_85 : f32 to vector<8x128xf32>
    %240 = arith.subf %239, %231 : vector<8x128xf32>
    %241 = arith.mulf %240, %238 : vector<8x128xf32>
    %242 = arith.mulf %231, %207 : vector<8x128xf32>
    %243 = arith.addf %241, %242 : vector<8x128xf32>
    %c40_86 = arith.constant 40 : index
    %c0_87 = arith.constant 0 : index
    %244 = vector.load %arg6[%c40_86, %c0_87] : memref<64x256xf32, #tpu.memory_space<vmem>>, vector<8x128xf32>
    tpu.vector_store %arg6[%c40_86, %c0_87], %243 {strides = array<i32>} : memref<64x256xf32, #tpu.memory_space<vmem>>, vector<8x128xf32>,
    %c16_88 = arith.constant 16 : index
    %c128_89 = arith.constant 128 : index
    %245 = vector.load %arg6[%c16_88, %c128_89] : memref<64x256xf32, #tpu.memory_space<vmem>>, vector<8x128xf32>
    tpu.vector_store %arg6[%c16_88, %c128_89], %243 {strides = array<i32>} : memref<64x256xf32, #tpu.memory_space<vmem>>, vector<8x128xf32>,
    %246 = arith.truncf %243 : vector<8x128xf32> to vector<8x128xbf16>
    %c0_90 = arith.constant 0 : index
    %c0_91 = arith.constant 0 : index
    %247 = vector.load %arg3[%c0_90, %c0_91] : memref<128x384xbf16, #tpu.memory_space<vmem>>, vector<128x384xbf16>
    %cst_92 = arith.constant dense<0.000000e+00> : vector<8x384xf32>
    %248 = tpu.matmul %246, %247, %cst_92 {dimension_numbers = #tpu.dot_dimension_numbers<[1], [0], [0], [1], [0, 0, 1, 1], [], []>} : vector<8x128xbf16>, vector<128x384xbf16>, vector<8x384xf32> -> vector<8x384xf32>
    %c48_93 = arith.constant 48 : index
    %c0_94 = arith.constant 0 : index
    %249 = vector.load %arg7[%c48_93, %c0_94] : memref<64x384xf32, #tpu.memory_space<vmem>>, vector<8x384xf32>
    %c8_95 = arith.constant 8 : index
    %c0_96 = arith.constant 0 : index
    %250 = vector.load %arg7[%c8_95, %c0_96] : memref<64x384xf32, #tpu.memory_space<vmem>>, vector<8x384xf32>
    %251 = arith.select %29, %249, %250 : vector<8x384xi1>, vector<8x384xf32>
    %252 = vector.extract_strided_slice %251 {offsets = [0, 0], sizes = [8, 128], strides = [1, 1]} : vector<8x384xf32> to vector<8x128xf32>
    %253 = vector.extract_strided_slice %248 {offsets = [0, 0], sizes = [8, 128], strides = [1, 1]} : vector<8x384xf32> to vector<8x128xf32>
    %254 = arith.addf %252, %253 : vector<8x128xf32>
    %255 = arith.negf %254 : vector<8x128xf32>
    %256 = math.exp %255 : vector<8x128xf32>
    %cst_97 = arith.constant 1.000000e+00 : f32
    %257 = vector.broadcast %cst_97 : f32 to vector<8x128xf32>
    %258 = arith.addf %257, %256 : vector<8x128xf32>
    %259 = arith.divf %257, %258 : vector<8x128xf32>
    %260 = vector.extract_strided_slice %251 {offsets = [0, 128], sizes = [8, 128], strides = [1, 1]} : vector<8x384xf32> to vector<8x128xf32>
    %261 = vector.extract_strided_slice %248 {offsets = [0, 128], sizes = [8, 128], strides = [1, 1]} : vector<8x384xf32> to vector<8x128xf32>
    %262 = arith.addf %260, %261 : vector<8x128xf32>
    %263 = arith.negf %262 : vector<8x128xf32>
    %264 = math.exp %263 : vector<8x128xf32>
    %cst_98 = arith.constant 1.000000e+00 : f32
    %265 = vector.broadcast %cst_98 : f32 to vector<8x128xf32>
    %266 = arith.addf %265, %264 : vector<8x128xf32>
    %267 = arith.divf %265, %266 : vector<8x128xf32>
    %268 = vector.extract_strided_slice %251 {offsets = [0, 256], sizes = [8, 128], strides = [1, 1]} : vector<8x384xf32> to vector<8x128xf32>
    %269 = vector.extract_strided_slice %248 {offsets = [0, 256], sizes = [8, 128], strides = [1, 1]} : vector<8x384xf32> to vector<8x128xf32>
    %270 = vector.broadcast %7 : vector<1x128xf32> to vector<8x128xf32>
    %271 = arith.addf %269, %270 : vector<8x128xf32>
    %272 = arith.mulf %259, %271 : vector<8x128xf32>
    %273 = arith.addf %268, %272 : vector<8x128xf32>
    %274 = math.tanh %273 : vector<8x128xf32>
    %cst_99 = arith.constant 1.000000e+00 : f32
    %275 = vector.broadcast %cst_99 : f32 to vector<8x128xf32>
    %276 = arith.subf %275, %267 : vector<8x128xf32>
    %277 = arith.mulf %276, %274 : vector<8x128xf32>
    %278 = arith.mulf %267, %243 : vector<8x128xf32>
    %279 = arith.addf %277, %278 : vector<8x128xf32>
    %c48_100 = arith.constant 48 : index
    %c0_101 = arith.constant 0 : index
    %280 = vector.load %arg6[%c48_100, %c0_101] : memref<64x256xf32, #tpu.memory_space<vmem>>, vector<8x128xf32>
    tpu.vector_store %arg6[%c48_100, %c0_101], %279 {strides = array<i32>} : memref<64x256xf32, #tpu.memory_space<vmem>>, vector<8x128xf32>,
    %c8_102 = arith.constant 8 : index
    %c128_103 = arith.constant 128 : index
    %281 = vector.load %arg6[%c8_102, %c128_103] : memref<64x256xf32, #tpu.memory_space<vmem>>, vector<8x128xf32>
    tpu.vector_store %arg6[%c8_102, %c128_103], %279 {strides = array<i32>} : memref<64x256xf32, #tpu.memory_space<vmem>>, vector<8x128xf32>,
    %282 = arith.truncf %279 : vector<8x128xf32> to vector<8x128xbf16>
    %c0_104 = arith.constant 0 : index
    %c0_105 = arith.constant 0 : index
    %283 = vector.load %arg3[%c0_104, %c0_105] : memref<128x384xbf16, #tpu.memory_space<vmem>>, vector<128x384xbf16>
    %cst_106 = arith.constant dense<0.000000e+00> : vector<8x384xf32>
    %284 = tpu.matmul %282, %283, %cst_106 {dimension_numbers = #tpu.dot_dimension_numbers<[1], [0], [0], [1], [0, 0, 1, 1], [], []>} : vector<8x128xbf16>, vector<128x384xbf16>, vector<8x384xf32> -> vector<8x384xf32>
    %c56_107 = arith.constant 56 : index
    %c0_108 = arith.constant 0 : index
    %285 = vector.load %arg7[%c56_107, %c0_108] : memref<64x384xf32, #tpu.memory_space<vmem>>, vector<8x384xf32>
    %c0_109 = arith.constant 0 : index
    %c0_110 = arith.constant 0 : index
    %286 = vector.load %arg7[%c0_109, %c0_110] : memref<64x384xf32, #tpu.memory_space<vmem>>, vector<8x384xf32>
    %287 = arith.select %29, %285, %286 : vector<8x384xi1>, vector<8x384xf32>
    %288 = vector.extract_strided_slice %287 {offsets = [0, 0], sizes = [8, 128], strides = [1, 1]} : vector<8x384xf32> to vector<8x128xf32>
    %289 = vector.extract_strided_slice %284 {offsets = [0, 0], sizes = [8, 128], strides = [1, 1]} : vector<8x384xf32> to vector<8x128xf32>
    %290 = arith.addf %288, %289 : vector<8x128xf32>
    %291 = arith.negf %290 : vector<8x128xf32>
    %292 = math.exp %291 : vector<8x128xf32>
    %cst_111 = arith.constant 1.000000e+00 : f32
    %293 = vector.broadcast %cst_111 : f32 to vector<8x128xf32>
    %294 = arith.addf %293, %292 : vector<8x128xf32>
    %295 = arith.divf %293, %294 : vector<8x128xf32>
    %296 = vector.extract_strided_slice %287 {offsets = [0, 128], sizes = [8, 128], strides = [1, 1]} : vector<8x384xf32> to vector<8x128xf32>
    %297 = vector.extract_strided_slice %284 {offsets = [0, 128], sizes = [8, 128], strides = [1, 1]} : vector<8x384xf32> to vector<8x128xf32>
    %298 = arith.addf %296, %297 : vector<8x128xf32>
    %299 = arith.negf %298 : vector<8x128xf32>
    %300 = math.exp %299 : vector<8x128xf32>
    %cst_112 = arith.constant 1.000000e+00 : f32
    %301 = vector.broadcast %cst_112 : f32 to vector<8x128xf32>
    %302 = arith.addf %301, %300 : vector<8x128xf32>
    %303 = arith.divf %301, %302 : vector<8x128xf32>
    %304 = vector.extract_strided_slice %287 {offsets = [0, 256], sizes = [8, 128], strides = [1, 1]} : vector<8x384xf32> to vector<8x128xf32>
    %305 = vector.extract_strided_slice %284 {offsets = [0, 256], sizes = [8, 128], strides = [1, 1]} : vector<8x384xf32> to vector<8x128xf32>
    %306 = vector.broadcast %7 : vector<1x128xf32> to vector<8x128xf32>
    %307 = arith.addf %305, %306 : vector<8x128xf32>
    %308 = arith.mulf %295, %307 : vector<8x128xf32>
    %309 = arith.addf %304, %308 : vector<8x128xf32>
    %310 = math.tanh %309 : vector<8x128xf32>
    %cst_113 = arith.constant 1.000000e+00 : f32
    %311 = vector.broadcast %cst_113 : f32 to vector<8x128xf32>
    %312 = arith.subf %311, %303 : vector<8x128xf32>
    %313 = arith.mulf %312, %310 : vector<8x128xf32>
    %314 = arith.mulf %303, %279 : vector<8x128xf32>
    %315 = arith.addf %313, %314 : vector<8x128xf32>
    %c56_114 = arith.constant 56 : index
    %c0_115 = arith.constant 0 : index
    %316 = vector.load %arg6[%c56_114, %c0_115] : memref<64x256xf32, #tpu.memory_space<vmem>>, vector<8x128xf32>
    tpu.vector_store %arg6[%c56_114, %c0_115], %315 {strides = array<i32>} : memref<64x256xf32, #tpu.memory_space<vmem>>, vector<8x128xf32>,
    %c0_116 = arith.constant 0 : index
    %c128_117 = arith.constant 128 : index
    %317 = vector.load %arg6[%c0_116, %c128_117] : memref<64x256xf32, #tpu.memory_space<vmem>>, vector<8x128xf32>
    tpu.vector_store %arg6[%c0_116, %c128_117], %315 {strides = array<i32>} : memref<64x256xf32, #tpu.memory_space<vmem>>, vector<8x128xf32>,
    return
  }
}

</mosaic_0001>

<bundles_post_ra>
// kernel: attention_read_forward.1
= control target key start
LH: loop header
LB: loop body
LE: loop exit
PB: predicated region body
PF: predicated region fallthrough
CT: control target
= control target key end

     0   :  { %v3980_v1 = vmov 0   ;;  %vm507_vm0 = vcmask 1045504   ;;  %vm494_vm1 = vcmask 359424   ;;  %vm3982_vm2 = vmmov 0   ;;  %s5252_s1 = inlined_call_operand.vmem [shape: bf16[300,384], index: 1, kind: input, shape index: {}]   ;;  %s5253_s0 = inlined_call_operand.vmem [shape: bf16[64,300], index: 0, kind: input, shape index: {}]   ;;  %s5254_s3 = inlined_call_operand.vmem [shape: bf16[128,384], index: 3, kind: input, shape index: {}]   ;;  %s5255_s5 = inlined_call_operand.vmem [shape: f32[1,128], index: 5, kind: input, shape index: {}]   ;;  %s5256_s2 = inlined_call_operand.vmem [shape: f32[1,384], index: 2, kind: input, shape index: {}]   ;;  %s5257_s4 = inlined_call_operand.vmem [shape: f32[1,128], index: 4, kind: input, shape index: {}]   ;;  %s5258_s6 = inlined_call_operand.vmem [shape: f32[64,256], index: 6, kind: output, shape index: {}]  }
   0x1   :  { %v3695_v0 = vld [vmem:[%s5252_s1 + $0x4] ss:$12 sps:$4 sm:$0xff]   ;;  %622 = vmatprep.mubr.bf16.mxu1 %v3980_v1  ;;  %v3699_v3 = vld [vmem:[%s5252_s1] ss:$12 sps:$4 sm:$0xff]   ;;  %v3701_v5 = vld [vmem:[%s5252_s1 + $0x1c] ss:$12 sps:$4 sm:$0xff]  }
   0x2   :  { %v3697_v2 = vld [vmem:[%s5252_s1 + $0x184] ss:$12 sps:$4 sm:$0xff]   ;;  %517 = vmatprep.subr.bf16.mxu0 %v3695_v0  ;;  %v3700_v4 = vld [vmem:[%s5252_s1 + $0x180] ss:$12 sps:$4 sm:$0xff]   ;;  %v3703_v6 = vld [vmem:[%s5252_s1 + $0x19c] ss:$12 sps:$4 sm:$0xff]  }
   0x3   :  { %590 = vmatprep.subr.bf16.mxu1 %v3697_v2  ;;  %518 = vmatpush1.bf16.msra.mxu0 %v3699_v3  ;;  %v3705_v7 = vld [vmem:[%s5252_s1 + $0x18] ss:$12 sps:$4 sm:$0xff]   ;;  %v3707_v9 = vld [vmem:[%s5252_s1 + $0x34] ss:$12 sps:$4 sm:$0xff]   ;;  %v3711_v11 = vld [vmem:[%s5252_s1 + $0x30] ss:$12 sps:$4 sm:$0xff]  }
   0x4   :  { %591 = vmatpush1.bf16.msra.mxu1 %v3700_v4  ;;  %519 = vmatprep.subr.bf16.mxu0 %v3701_v5  ;;  %v3706_v8 = vld [vmem:[%s5252_s1 + $0x198] ss:$12 sps:$4 sm:$0xff]   ;;  %v3709_v10 = vld [vmem:[%s5252_s1 + $0x1b4] ss:$12 sps:$4 sm:$0x3f]  }
   0x5   :  { %592 = vmatprep.subr.bf16.mxu1 %v3703_v6  ;;  %v3712_v12 = vld [vmem:[%s5252_s1 + $0x1b0] ss:$12 sps:$4 sm:$0x3f]   ;;  %v3713_v13 = vld [vmem:[%s5252_s1 + $0x4c] ss:$12 sps:$4 sm:$0xff]  }
   0x6   :  { %v4062_v14 = vld [vmem:[%s5253_s0 + $0x8] ss:$12 sps:$4 sm:$0xff]   ;;  %v509_v15 = vsel %vm507_vm0, %v3712_v12, 0  ;;  %v3719_v19 = vld [vmem:[%s5252_s1 + $0x64] ss:$12 sps:$4 sm:$0xff]  }
   0x7   :  { %520 = vmatpush1.bf16.msra.mxu0 %v3705_v7  ;;  %v3716_v16 = vld [vmem:[%s5252_s1 + $0xc8] ss:$12 sps:$4 sm:$0xff]   ;;  %v3721_v20 = vld [vmem:[%s5252_s1 + $0xe0] ss:$12 sps:$4 sm:$0xff]   ;;  %v3727_v25 = vld [vmem:[%s5252_s1 + $0xf8] ss:$12 sps:$4 sm:$0xff]  }
   0x8   :  { %593 = vmatpush1.bf16.msra.mxu1 %v3706_v8  ;;  %521 = vmatprep.subr.bf16.mxu0 %v3707_v9  ;;  %v3717_v17 = vld [vmem:[%s5252_s1 + $0x48] ss:$12 sps:$4 sm:$0xff]   ;;  %v3722_v21 = vld [vmem:[%s5252_s1 + $0x60] ss:$12 sps:$4 sm:$0xff]   ;;  %v3728_v26 = vld [vmem:[%s5252_s1 + $0x78] ss:$12 sps:$4 sm:$0xff]  }
   0x9   :  { %3147 = vmatprep.subr.msk.bf16.mxu1 %vm507_vm0, %v3709_v10  ;;  %v3718_v18 = vld [vmem:[%s5252_s1 + $0x8] ss:$12 sps:$4 sm:$0xff]   ;;  %v3723_v22 = vld [vmem:[%s5252_s1 + $0x20] ss:$12 sps:$4 sm:$0xff]   ;;  %v3729_v27 = vld [vmem:[%s5252_s1 + $0x38] ss:$12 sps:$4 sm:$0xff]  }
   0xa   :  { %v3724_v23 = vld [vmem:[%s5252_s1 + $0x7c] ss:$12 sps:$4 sm:$0xff]   ;;  %v4094_v24 = vld [vmem:[%s5253_s0 + $0x20] ss:$12 sps:$4 sm:$0xff]   ;;  %v4127_v33 = vld [vmem:[%s5253_s0 + $0x38] ss:$12 sps:$4 sm:$0xff]  }
   0xb   :  { %522 = vmatpush1.bf16.msra.mxu0 %v3711_v11  ;;  %v3730_v28 = vld [vmem:[%s5252_s1 + $0x94] ss:$12 sps:$4 sm:$0xff]   ;;  %v3732_v29 = vld [vmem:[%s5252_s1 + $0x110] ss:$12 sps:$4 sm:$0xff]   ;;  %v3735_v32 = vld [vmem:[%s5252_s1 + $0xac] ss:$12 sps:$4 sm:$0xff]  }
   0xc   :  { %595 = vmatpush1.bf16.msra.mxu1 %v509_v15  ;;  %523 = vmatprep.subr.bf16.mxu0 %v3713_v13  ;;  %v3733_v30 = vld [vmem:[%s5252_s1 + $0x90] ss:$12 sps:$4 sm:$0xff]   ;;  %v3738_v34 = vld [vmem:[%s5252_s1 + $0x128] ss:$12 sps:$4 sm:$0xff]   ;;  %v3743_v38 = vld [vmem:[%s5252_s1 + $0x140] ss:$12 sps:$4 sm:$0xff]  }
   0xd   :  { %3366 = vmatprep.subr.bf16.mxu1 %v3716_v16  ;;  %v3734_v31 = vld [vmem:[%s5252_s1 + $0x50] ss:$12 sps:$4 sm:$0xff]   ;;  %v3739_v35 = vld [vmem:[%s5252_s1 + $0xa8] ss:$12 sps:$4 sm:$0xff]   ;;  %v3744_v39 = vld [vmem:[%s5252_s1 + $0xc0] ss:$12 sps:$4 sm:$0xff]  }
   0xe   :  { %v3740_v36 = vld [vmem:[%s5252_s1 + $0x68] ss:$12 sps:$4 sm:$0xff]   ;;  %v3741_v37 = vld [vmem:[%s5252_s1 + $0xc4] ss:$12 sps:$4 sm:$0xff]   ;;  %v3745_v40 = vld [vmem:[%s5252_s1 + $0x80] ss:$12 sps:$4 sm:$0xff]  }
   0xf   :  { %3148 = vmatmul.mubr.msk.bf16.vlgmr.msra.gmra.mrb[0].mxu1 %vm494_vm1, %v4062_v14  ;;  %524 = vmatpush1.bf16.msra.mxu0 %v3717_v17  ;;  %v3746_v41 = vld [vmem:[%s5252_s1 + $0xdc] ss:$12 sps:$4 sm:$0xff]   ;;  %v3749_v42 = vld [vmem:[%s5252_s1 + $0x158] ss:$12 sps:$4 sm:$0xff]   ;;  %v3752_v46 = vld [vmem:[%s5252_s1 + $0xf4] ss:$12 sps:$4 sm:$0xff]  }
  0x10   :  { %3367 = vmatpush3.bf16.msra.mxu1 %v3718_v18  ;;  %525 = vmatprep.subr.bf16.mxu0 %v3719_v19  ;;  %v4162_v43 = vld [vmem:[%s5253_s0 + $0x50] ss:$12 sps:$4 sm:$0xff]   ;;  %v3750_v44 = vld [vmem:[%s5252_s1 + $0xd8] ss:$12 sps:$4 sm:$0xff]   ;;  %v3762_v52 = vld [vmem:[%s5252_s1 + $0x188] ss:$12 sps:$4 sm:$0xff]  }
  0x11   :  { %3368 = vmatprep.subr.bf16.mxu1 %v3721_v20  ;;  %632 = vmatprep.mubr.bf16.mxu1 %v3980_v1  ;;  %v3751_v45 = vld [vmem:[%s5252_s1 + $0x98] ss:$12 sps:$4 sm:$0xff]   ;;  %v3754_v47 = vld [vmem:[%s5252_s1 + $0x170] ss:$12 sps:$4 sm:$0xff]   ;;  %v3757_v53 = vld [vmem:[%s5253_s0] ss:$12 sps:$4 sm:$0xff]  }
  0x12   :  { %v3755_v48 = vld [vmem:[%s5252_s1 + $0xf0] ss:$12 sps:$4 sm:$0xff]   ;;  %v3760_v51 = vld [vmem:[%s5252_s1 + $0x10c] ss:$12 sps:$4 sm:$0xff]   ;;  %v3763_v54 = vld [vmem:[%s5252_s1 + $0x108] ss:$12 sps:$4 sm:$0xff]  }
  0x13   :  { %526 = vmatpush1.bf16.msra.mxu0 %v3722_v21  ;;  %v3756_v49 = vld [vmem:[%s5252_s1 + $0xb0] ss:$12 sps:$4 sm:$0xff]   ;;  %v3773_v57 = vld [vmem:[%s5252_s1 + $0x1a0] ss:$12 sps:$4 sm:$0xff]   ;;  %v3771_v60 = vld [vmem:[%s5253_s0 + $0x18] ss:$12 sps:$4 sm:$0xff]  }
  0x14   :  { %3369 = vmatpush3.bf16.msra.mxu1 %v3723_v22  ;;  %527 = vmatprep.subr.bf16.mxu0 %v3724_v23  ;;  %v3759_v50 = vld [vmem:[%s5253_s0 + $0x4] ss:$12 sps:$4 sm:$0xff]   ;;  %v3767_v56 = vld [vmem:[%s5253_s0 + $0x1c] ss:$12 sps:$4 sm:$0xff]   ;;  %v3766_v58 = vld [vmem:[%s5252_s1 + $0x120] ss:$12 sps:$4 sm:$0xff]  }
  0x15   :  { %3370 = vmatprep.subr.bf16.mxu1 %v3727_v25  ;;  %549 = vmatprep.mubr.bf16.mxu0 %v3759_v50  ;;  %v3764_v55 = vld [vmem:[%s5252_s1 + $0x124] ss:$12 sps:$4 sm:$0xff]   ;;  %v3769_v59 = vld [vmem:[%s5252_s1 + $0x13c] ss:$12 sps:$4 sm:$0xff]   ;;  %v3777_v62 = vld [vmem:[%s5253_s0 + $0x34] ss:$12 sps:$4 sm:$0xff]  }
  0x16   :  { %v3772_v61 = vld [vmem:[%s5252_s1 + $0x138] ss:$12 sps:$4 sm:$0xff]   ;;  %v3774_v0 = vld [vmem:[%s5252_s1 + $0x154] ss:$12 sps:$4 sm:$0xff]   ;;  %v3776_v4 = vld [vmem:[%s5252_s1 + $0x150] ss:$12 sps:$4 sm:$0xff]  }
  0x17   :  { %3149 = vmatmul.mubr.msk.bf16.gmra.mrb[4].mxu1 %vm494_vm1, %v4094_v24  ;;  %528 = vmatpush1.bf16.msra.mxu0 %v3728_v26  ;;  %v3783_v63 = vld [vmem:[%s5252_s1 + $0x1b8] ss:$12 sps:$4 sm:$0x3f]   ;;  %v3781_v6 = vld [vmem:[%s5253_s0 + $0x30] ss:$12 sps:$4 sm:$0xff]   ;;  %v3981_v10 = vmov 0.0  }
  0x18   :  { %3371 = vmatpush3.bf16.msra.mxu1 %v3729_v27  ;;  %529 = vmatprep.subr.bf16.mxu0 %v3730_v28  ;;  %v515_v2 = vsel %vm507_vm0, %v3783_v63, 0  ;;  %v4234_v3 = vld [vmem:[%s5254_s3 + $0x4] ss:$12 sps:$4 sm:$0xff]   ;;  %v3779_v5 = vld [vmem:[%s5252_s1 + $0x16c] ss:$12 sps:$4 sm:$0xff]  }
  0x19   :  { %3372 = vmatprep.subr.bf16.mxu1 %v3732_v29  ;;  %642 = vmatprep.mubr.bf16.mxu1 %v3980_v1  ;;  %v3782_v7 = vld [vmem:[%s5252_s1 + $0x168] ss:$12 sps:$4 sm:$0xff]   ;;  %v3784_v8 = vld [vmem:[%s5253_s0 + $0x4c] ss:$12 sps:$4 sm:$0xff]   ;;  %v4305_v20 = vld [vmem:[%s5254_s3 + $0x30] ss:$12 sps:$4 sm:$0xff]  }
  0x1a   :  { %v3808_v9 = vld [vmem:[%s5254_s3 + $0x8] ss:$12 sps:$4 sm:$0xff]   ;;  %v3812_v12 = vld [vmem:[%s5254_s3 + $0x20] ss:$12 sps:$4 sm:$0xff]   ;;  %v3813_v13 = vld [vmem:[%s5254_s3 + $0x38] ss:$12 sps:$4 sm:$0xff]  }
  0x1b   :  { %530 = vmatpush1.bf16.msra.mxu0 %v3733_v30  ;;  %v3786_v11 = vld [vmem:[%s5253_s0 + $0x48] ss:$12 sps:$4 sm:$0xff]   ;;  %v4272_v15 = vld [vmem:[%s5254_s3] ss:$12 sps:$4 sm:$0xff]   ;;  %v4286_v17 = vld [vmem:[%s5254_s3 + $0x18] ss:$12 sps:$4 sm:$0xff]  }
  0x1c   :  { %3373 = vmatpush3.bf16.msra.mxu1 %v3734_v31  ;;  %531 = vmatprep.subr.bf16.mxu0 %v3735_v32  ;;  %v4277_v16 = vld [vmem:[%s5254_s3 + $0x1c] ss:$12 sps:$4 sm:$0xff]   ;;  %v4293_v18 = vld [vmem:[%s5254_s3 + $0x34] ss:$12 sps:$4 sm:$0xff]   ;;  %v4311_v21 = vld [vmem:[%s5254_s3 + $0x4c] ss:$12 sps:$4 sm:$0xff]  }
  0x1d   :  { %3374 = vmatprep.subr.bf16.mxu1 %v3738_v34  ;;  %v3815_v19 = vld [vmem:[%s5254_s3 + $0x68] ss:$12 sps:$4 sm:$0xff]   ;;  %v3816_v22 = vld [vmem:[%s5254_s3 + $0x80] ss:$12 sps:$4 sm:$0xff]   ;;  %v3817_v25 = vld [vmem:[%s5254_s3 + $0x98] ss:$12 sps:$4 sm:$0xff]  }
  0x1e   :  { %v4321_v23 = vld [vmem:[%s5254_s3 + $0x48] ss:$12 sps:$4 sm:$0xff]   ;;  %v4340_v26 = vld [vmem:[%s5254_s3 + $0x60] ss:$12 sps:$4 sm:$0xff]   ;;  %v3818_v28 = vld [vmem:[%s5254_s3 + $0xb0] ss:$12 sps:$4 sm:$0xff]  }
  0x1f   :  { %3150 = vmatmul.mubr.msk.bf16.gmra.mrb[8].mxu1 %vm494_vm1, %v4127_v33  ;;  %532 = vmatpush1.bf16.msra.mxu0 %v3739_v35  ;;  %v4346_v27 = vld [vmem:[%s5254_s3 + $0x7c] ss:$12 sps:$4 sm:$0xff]   ;;  %v4358_v29 = vld [vmem:[%s5255_s5] ss:$0 sm:$0xff]  ;;  %v4363_v30 = vld [vmem:[%s5254_s3 + $0x78] ss:$12 sps:$4 sm:$0xff]  }
  0x20   :  { %3375 = vmatpush3.bf16.msra.mxu1 %v3740_v36  ;;  %533 = vmatprep.subr.bf16.mxu0 %v3741_v37  ;;  %v4369_v31 = vld [vmem:[%s5254_s3 + $0x94] ss:$12 sps:$4 sm:$0xff]   ;;  %v4376_v32 = vld [vmem:[%s5254_s3 + $0x90] ss:$12 sps:$4 sm:$0xff]   ;;  %v4384_v34 = vld [vmem:[%s5254_s3 + $0xac] ss:$12 sps:$4 sm:$0xff]  }
  0x21   :  { %3376 = vmatprep.subr.bf16.mxu1 %v3743_v38  ;;  %652 = vmatprep.mubr.bf16.mxu1 %v3980_v1  ;;  %v4393_v35 = vld [vmem:[%s5254_s3 + $0xa8] ss:$12 sps:$4 sm:$0xff]   ;;  %v3820_v37 = vld [vmem:[%s5254_s3 + $0x20] ss:$12 sps:$4 sm:$0xff]   ;;  %v3821_v38 = vld [vmem:[%s5254_s3 + $0x38] ss:$12 sps:$4 sm:$0xff]  }
  0x22   :  { %v3819_v36 = vld [vmem:[%s5254_s3 + $0x8] ss:$12 sps:$4 sm:$0xff]  }
  0x23   :  { %534 = vmatpush1.bf16.msra.mxu0 %v3744_v39  ;;  %v3822_v39 = vld [vmem:[%s5254_s3 + $0x50] ss:$12 sps:$4 sm:$0xff]  }
  0x24   :  { %3377 = vmatpush3.bf16.msra.mxu1 %v3745_v40  ;;  %535 = vmatprep.subr.bf16.mxu0 %v3746_v41 }
  0x25   :  { %3378 = vmatprep.subr.bf16.mxu1 %v3749_v42  ;;  %v3823_v42 = vld [vmem:[%s5254_s3 + $0x68] ss:$12 sps:$4 sm:$0xff]  }
  0x27   :  { %3151 = vmatmul.mubr.msk.bf16.gmra.mrb[12].mxu1 %vm494_vm1, %v4162_v43  ;;  %536 = vmatpush1.bf16.msra.mxu0 %v3750_v44 }
  0x28   :  { %3379 = vmatpush3.bf16.msra.mxu1 %v3751_v45  ;;  %537 = vmatprep.subr.bf16.mxu0 %v3752_v46  ;;  %v3824_v45 = vld [vmem:[%s5254_s3 + $0x80] ss:$12 sps:$4 sm:$0xff]  }
  0x29   :  { %3380 = vmatprep.subr.bf16.mxu1 %v3754_v47  ;;  %695 = vmatprep.mubr.bf16.mxu1 %v3759_v50 }
  0x2b   :  { %538 = vmatpush1.bf16.msra.mxu0 %v3755_v48  ;;  %v3825_v48 = vld [vmem:[%s5254_s3 + $0x98] ss:$12 sps:$4 sm:$0xff]  }
  0x2c   :  { %3381 = vmatpush3.bf16.msra.mxu1 %v3756_v49  ;;  %539 = vmatprep.subr.bf16.mxu0 %v3760_v51  ;;  %v3826_v51 = vld [vmem:[%s5254_s3 + $0xb0] ss:$12 sps:$4 sm:$0xff]  }
  0x2d   :  { %3485 = vmatprep.subr.bf16.mxu1 %v3762_v52 }
  0x2f   :  { %696 = vmatmul.mubr.bf16.vlgmr.msra.gmra.mrb[16].mxu1 %v3757_v53  ;;  %540 = vmatpush1.bf16.msra.mxu0 %v3763_v54 }
  0x30   :  { %3486 = vmatpush3.bf16.msra.mxu1 %v3762_v52  ;;  %541 = vmatprep.subr.bf16.mxu0 %v3764_v55 }
  0x31   :  { %703 = vmatprep.mubr.bf16.mxu1 %v3767_v56  ;;  %3487 = vmatprep.subr.bf16.mxu1 %v3773_v57 }
  0x33   :  { %542 = vmatpush1.bf16.msra.mxu0 %v3766_v58 }
  0x34   :  { %3488 = vmatpush3.bf16.msra.mxu1 %v3773_v57  ;;  %543 = vmatprep.subr.bf16.mxu0 %v3769_v59  ;;  %v118_v57 = vlaneseq }
  0x35   :  { %3691 = vmatprep.subr.msk.bf16.mxu1 %vm507_vm0, %v3783_v63 }
  0x37   :  { %704 = vmatmul.mubr.bf16.gmra.mrb[20].mxu1 %v3771_v60  ;;  %544 = vmatpush1.bf16.msra.mxu0 %v3772_v61  ;;  %v119_v61 = vshrl.u32 %v118_v57, 7 }
  0x38   :  { %711 = vmatprep.mubr.bf16.mxu1 %v3777_v62  ;;  %545 = vmatprep.subr.bf16.mxu0 %v3774_v0 }
  0x39   :  { %3490 = vmatpush3.bf16.msra.mxu1 %v515_v2  ;;  %v128_v63 = vsub.s32 2, %v119_v61  ;;  %v116_v2 = vld [vmem:[%s5256_s2] sm:$0x7] }
  0x3a   :  { %1029 = vmatprep.subr.bf16.mxu1 %v4234_v3 }
  0x3b   :  { %546 = vmatpush1.bf16.msra.mxu0 %v3776_v4 }
  0x3c   :  { %547 = vmatprep.subr.bf16.mxu0 %v3779_v5 }
  0x3f   :  { %712 = vmatmul.mubr.bf16.gmra.mrb[24].mxu1 %v3781_v6  ;;  %548 = vmatpush1.bf16.msra.mxu0 %v3782_v7  ;;  %v4483_v7 = vrot.slane %v116_v2, %v128_v63 }
  0x40   :  { %719 = vmatprep.mubr.bf16.mxu1 %v3784_v8  ;;  %3499 = vmatprep.subr.bf16.mxu0 %v3981_v10 }
  0x42   :  { %550 = vmatmul.mubr.bf16.vlgmr.msra.gmra.mrb[0].mxu0 %v3757_v53 }
  0x43   :  { %559 = vmatprep.mubr.bf16.mxu0 %v3767_v56  ;;  %3500 = vmatpush3.bf16.msra.mxu0 %v3808_v9 }
  0x44   :  { %3501 = vmatprep.subr.bf16.mxu0 %v3981_v10 }
  0x47   :  { %720 = vmatmul.mubr.bf16.gmra.mrb[28].mxu1 %v3786_v11  ;;  %3502 = vmatpush3.bf16.msra.mxu0 %v3812_v12 }
  0x48   :  { %3491 = vmatprep.mubr.msk.bf16.mxu1 %vm494_vm1, %v4062_v14  ;;  %3503 = vmatprep.subr.bf16.mxu0 %v3981_v10  ;;  %v3814_v14 = vld [vmem:[%s5254_s3 + $0x50] ss:$12 sps:$4 sm:$0xff]  }
  0x4a   :  { %560 = vmatmul.mubr.bf16.gmra.mrb[4].mxu0 %v3771_v60 }
  0x4b   :  { %569 = vmatprep.mubr.bf16.mxu0 %v3777_v62  ;;  %3504 = vmatpush3.bf16.msra.mxu0 %v3813_v13 }
  0x4c   :  { %3505 = vmatprep.subr.bf16.mxu0 %v3981_v10 }
  0x4f   :  { %3492 = vmatmul.mubr.msk.bf16.vlgmr.msra.gmra.mrb[32].mxu1 %vm494_vm1, %v4094_v24  ;;  %3506 = vmatpush3.bf16.msra.mxu0 %v3814_v14  ;;  %v4329_v24 = vld [vmem:[%s5254_s3 + $0x64] ss:$12 sps:$4 sm:$0xff]  }
  0x50   :  { %1030 = vmatpush1.bf16.msra.mxu1 %v4272_v15  ;;  %3495 = vmatprep.mubr.msk.bf16.mxu1 %vm494_vm1, %v4127_v33  ;;  %v868_v33 = vpack.c.bf16 %v4358_v29, %v4358_v29 }
  0x51   :  { %1031 = vmatprep.subr.bf16.mxu1 %v4277_v16  ;;  %3507 = vmatprep.subr.bf16.mxu0 %v3981_v10 }
  0x52   :  { %570 = vmatmul.mubr.bf16.gmra.mrb[8].mxu0 %v3781_v6 }
  0x53   :  { %579 = vmatprep.mubr.bf16.mxu0 %v3784_v8  ;;  %3508 = vmatpush3.bf16.msra.mxu0 %v3815_v19 }
  0x54   :  { %1032 = vmatpush1.bf16.msra.mxu1 %v4286_v17  ;;  %3509 = vmatprep.subr.bf16.mxu0 %v3981_v10 }
  0x55   :  { %1033 = vmatprep.subr.bf16.mxu1 %v4293_v18 }
  0x57   :  { %3496 = vmatmul.mubr.msk.bf16.gmra.mrb[36].mxu1 %vm494_vm1, %v4162_v43  ;;  %3510 = vmatpush3.bf16.msra.mxu0 %v3816_v22 }
  0x58   :  { %1034 = vmatpush1.bf16.msra.mxu1 %v4305_v20  ;;  %1061 = vmatprep.mubr.bf16.mxu1 %v3980_v1 }
  0x59   :  { %1035 = vmatprep.subr.bf16.mxu1 %v4311_v21  ;;  %3511 = vmatprep.subr.bf16.mxu0 %v3981_v10 }
  0x5a   :  { %580 = vmatmul.mubr.bf16.gmra.mrb[12].mxu0 %v3786_v11 }
  0x5b   :  { %3515 = vmatprep.mubr.msk.bf16.mxu0 %vm3982_vm2, %v3981_v10  ;;  %3512 = vmatpush3.bf16.msra.mxu0 %v3817_v25  ;;  %v120_v25 = vsub.s32 0, %v119_v61 }
  0x5c   :  { %1036 = vmatpush1.bf16.msra.mxu1 %v4321_v23  ;;  %3513 = vmatprep.subr.bf16.mxu0 %v3981_v10 }
  0x5d   :  { %1037 = vmatprep.subr.bf16.mxu1 %v4329_v24 }
  0x5f   :  { %3514 = vmatpush3.bf16.msra.mxu0 %v3818_v28  ;;  %v124_v28 = vsub.s32 1, %v119_v61 }
  0x60   :  { %1038 = vmatpush1.bf16.msra.mxu1 %v4340_v26  ;;  %3519 = vmatprep.subr.bf16.mxu0 %v3981_v10 }
  0x61   :  { %1039 = vmatprep.subr.bf16.mxu1 %v4346_v27 }
  0x62   :  { %3516 = vmatmul.mubr.bf16.vlgmr.msra.gmra.mrb[16].mxu0 %v868_v33 }
  0x63   :  { %3535 = vmatprep.mubr.msk.bf16.mxu0 %vm3982_vm2, %v3981_v10  ;;  %3520 = vmatpush3.bf16.msra.mxu0 %v3819_v36 }
  0x64   :  { %1040 = vmatpush1.bf16.msra.mxu1 %v4363_v30  ;;  %3521 = vmatprep.subr.bf16.mxu0 %v3981_v10 }
  0x65   :  { %1041 = vmatprep.subr.bf16.mxu1 %v4369_v31 }
  0x67   :  { %3522 = vmatpush3.bf16.msra.mxu0 %v3820_v37 }
  0x68   :  { %1042 = vmatpush1.bf16.msra.mxu1 %v4376_v32  ;;  %3523 = vmatprep.subr.bf16.mxu0 %v3981_v10 }
  0x69   :  { %1043 = vmatprep.subr.bf16.mxu1 %v4384_v34 }
  0x6b   :  { %3524 = vmatpush3.bf16.msra.mxu0 %v3821_v38  ;;  %v4490_v38 = vrot.slane %v116_v2, %v120_v25 }
  0x6c   :  { %1044 = vmatpush1.bf16.msra.mxu1 %v4393_v35  ;;  %3525 = vmatprep.subr.bf16.mxu0 %v3981_v10 }
  0x6d   :  { %1310 = vmatprep.subr.bf16.mxu1 %v4234_v3 }
  0x6f   :  { %1062 = vmatmul.mubr.bf16.vlgmr.msra.gmra.mrb[40].mxu1 %v868_v33  ;;  %3526 = vmatpush3.bf16.msra.mxu0 %v3822_v39 }
  0x70   :  { %1311 = vmatpush1.bf16.msra.mxu1 %v4272_v15  ;;  %1342 = vmatprep.mubr.bf16.mxu1 %v3980_v1 }
  0x71   :  { %1312 = vmatprep.subr.bf16.mxu1 %v4277_v16  ;;  %3527 = vmatprep.subr.bf16.mxu0 %v3981_v10 }
  0x73   :  { %3528 = vmatpush3.bf16.msra.mxu0 %v3823_v42 }
  0x74   :  { %1313 = vmatpush1.bf16.msra.mxu1 %v4286_v17  ;;  %3529 = vmatprep.subr.bf16.mxu0 %v3981_v10 }
  0x75   :  { %1314 = vmatprep.subr.bf16.mxu1 %v4293_v18 }
  0x77   :  { %3530 = vmatpush3.bf16.msra.mxu0 %v3824_v45  ;;  %v4492_v45 = vrot.slane %v116_v2, %v124_v28 }
  0x78   :  { %1315 = vmatpush1.bf16.msra.mxu1 %v4305_v20  ;;  %3531 = vmatprep.subr.bf16.mxu0 %v3981_v10 }
  0x79   :  { %1316 = vmatprep.subr.bf16.mxu1 %v4311_v21 }
  0x7b   :  { %3532 = vmatpush3.bf16.msra.mxu0 %v3825_v48 }
  0x7c   :  { %1317 = vmatpush1.bf16.msra.mxu1 %v4321_v23  ;;  %3533 = vmatprep.subr.bf16.mxu0 %v3981_v10 }
  0x7d   :  { %1318 = vmatprep.subr.bf16.mxu1 %v4329_v24 }
  0x7f   :  { %3534 = vmatpush3.bf16.msra.mxu0 %v3826_v51 }
  0x80   :  { %1319 = vmatpush1.bf16.msra.mxu1 %v4340_v26  ;;  %3539 = vmatprep.subr.bf16.mxu0 %v3981_v10 }
  0x81   :  { %1320 = vmatprep.subr.bf16.mxu1 %v4346_v27 }
  0x84   :  { %1321 = vmatpush1.bf16.msra.mxu1 %v4363_v30 }
  0x85   :  { %1322 = vmatprep.subr.bf16.mxu1 %v4369_v31 }
  0x88   :  { %1323 = vmatpush1.bf16.msra.mxu1 %v4376_v32 }
  0x89   :  { %1324 = vmatprep.subr.bf16.mxu1 %v4384_v34 }
  0x8c   :  { %1325 = vmatpush1.bf16.msra.mxu1 %v4393_v35 }
  0x8d   :  { %1585 = vmatprep.subr.bf16.mxu1 %v4234_v3 }
  0xe2   :  { %v4431_v40 = vpop.f32.mrb[0].mxu1 }
  0xe3   :  { %v4434_v41 = vpop.f32.mrb[1].mxu1 }
  0xe4   :  { %v4439_v43 = vpop.f32.mrb[2].mxu1 }
  0xe5   :  { %v4441_v44 = vpop.f32.mrb[3].mxu1 }
  0xea   :  { %v4447_v46 = vpop.f32.mrb[4].mxu1 }
  0xeb   :  { %v4450_v47 = vpop.f32.mrb[5].mxu1 }
  0xec   :  { %v4455_v49 = vpop.f32.mrb[6].mxu1 }
  0xed   :  { %v4457_v50 = vpop.f32.mrb[7].mxu1 }
  0xf2   :  { %v4463_v52 = vpop.f32.mrb[8].mxu1 }
  0xf3   :  { %v4466_v53 = vpop.f32.mrb[9].mxu1 }
  0xf4   :  { %v4468_v54 = vpop.f32.mrb[10].mxu1 }
  0xf5   :  { %v4470_v55 = vpop.f32.mrb[11].mxu1 }
  0xfa   :  { %v4472_v56 = vpop.f32.mrb[12].mxu1 }
  0xfb   :  { %v4474_v58 = vpop.f32.mrb[13].mxu1 }
  0xfc   :  { %v4476_v59 = vpop.f32.mrb[14].mxu1 }
  0xfd   :  { %v4478_v60 = vpop.f32.mrb[15].mxu1 }
 0x102   :  { %v3382_v62 = vpop.f32.mrb[16].mxu1 }
 0x103   :  { %v3383_v0 = vpop.f32.mrb[17].mxu1 }
 0x104   :  { %v3384_v3 = vadd.f32 %v3383_v0, %v3382_v62  ;;  %v3385_v4 = vpop.f32.mrb[18].mxu1 }
 0x105   :  { %v3386_v5 = vpop.f32.mrb[19].mxu1 }
 0x106   :  { %v3387_v6 = vadd.f32 %v3386_v5, %v3385_v4 }
 0x108   :  { %v4486_v8 = vadd.f32 %v3387_v6, %v4483_v7 }
 0x10a   :  { %v3388_v9 = vpop.f32.mrb[20].mxu1 }
 0x10b   :  { %v3389_v11 = vpop.f32.mrb[21].mxu1 }
 0x10c   :  { %v3390_v12 = vadd.f32 %v3389_v11, %v3388_v9  ;;  %v3391_v13 = vpop.f32.mrb[22].mxu1 }
 0x10d   :  { %v3392_v14 = vpop.f32.mrb[23].mxu1 }
 0x10e   :  { %v3393_v19 = vadd.f32 %v3392_v14, %v3391_v13  ;;  %v706_v22 = vadd.f32 %v3390_v12, %v4483_v7 }
 0x110   :  { %v709_v33 = vadd.f32 %v3393_v19, %v4483_v7 }
 0x112   :  { %v3394_v36 = vpop.f32.mrb[24].mxu1 }
 0x113   :  { %v3395_v37 = vpop.f32.mrb[25].mxu1 }
 0x114   :  { %v3396_v39 = vadd.f32 %v3395_v37, %v3394_v36  ;;  %v3397_v42 = vpop.f32.mrb[26].mxu1 }
 0x115   :  { %v3398_v48 = vpop.f32.mrb[27].mxu1  ;;  %v551_v62 = vpop.f32.mrb[0].mxu0 }
 0x116   :  { %v3399_v51 = vadd.f32 %v3398_v48, %v3397_v42  ;;  %v4495_v63 = vadd.f32 %v3396_v39, %v4483_v7  ;;  %v552_v0 = vadd.f32 %v551_v62, %v4490_v38  ;;  %v553_v4 = vpop.f32.mrb[1].mxu0  ;;  %v4516_v39 = vand.u32 127, %v118_v57 }
 0x117   :  { %v554_v61 = vadd.f32 %v553_v4, %v4492_v45  ;;  %v555_v5 = vpop.f32.mrb[2].mxu0 }
 0x118   :  { %v4500_v6 = vadd.f32 %v3399_v51, %v4483_v7  ;;  %v4503_v9 = vadd.f32 %v4431_v40, %v552_v0  ;;  %v556_v2 = vadd.f32 %v555_v5, %v4490_v38  ;;  %v557_v11 = vpop.f32.mrb[3].mxu0  ;;  %v827_v5 = vadd.s32 128, %v4516_v39 }
 0x119   :  { %v4507_v12 = vadd.f32 %v4434_v41, %v554_v61  ;;  %v558_v13 = vadd.f32 %v557_v11, %v4492_v45  ;;  %vm865_vm3 = vcmp.lt.s32.totalorder %v4516_v39, 64 }
 0x11a   :  { %v3400_v14 = vpop.f32.mrb[28].mxu1  ;;  %v4511_v19 = vadd.f32 %v4439_v43, %v556_v2 }
 0x11b   :  { %v3401_v25 = vpop.f32.mrb[29].mxu1  ;;  %v4514_v28 = vadd.f32 %v4441_v44, %v558_v13  ;;  %v698_v13 = vadd.f32 %v3384_v3, %v4483_v7 }
 0x11c   :  { %v3402_v36 = vadd.f32 %v3401_v25, %v3400_v14  ;;  %v3403_v37 = vpop.f32.mrb[30].mxu1  ;;  %v828_v14 = vadd.s32 256, %v4516_v39 }
 0x11d   :  { %v3404_v40 = vpop.f32.mrb[31].mxu1  ;;  %v561_v48 = vpop.f32.mrb[4].mxu0 }
 0x11e   :  { %v3405_v42 = vadd.f32 %v3404_v40, %v3403_v37  ;;  %v722_v41 = vadd.f32 %v3402_v36, %v4483_v7  ;;  %v562_v51 = vadd.f32 %v561_v48, %v4490_v38  ;;  %v563_v62 = vpop.f32.mrb[5].mxu0 }
 0x11f   :  { %v564_v0 = vadd.f32 %v563_v62, %v4492_v45  ;;  %v565_v43 = vpop.f32.mrb[6].mxu0  ;;  %v840_v62 = vand.u32 127, %v827_v5  ;;  %v3979_v5 = vld [vmem:[%s5257_s4] ss:$0 sm:$0xff] }
 0x120   :  { %v635_v4 = vadd.f32 %v4447_v46, %v562_v51  ;;  %v566_v44 = vadd.f32 %v565_v43, %v4490_v38  ;;  %v567_v61 = vpop.f32.mrb[7].mxu0  ;;  %v847_v43 = vand.u32 127, %v828_v14 }
 0x121   :  { %v4525_v57 = vadd.f32 %v4450_v47, %v564_v0  ;;  %v568_v2 = vadd.f32 %v567_v61, %v4492_v45  ;;  %vm4548_vm4 = vcmp.lt.s32.totalorder %v840_v62, 64 }
 0x122   :  { %v3493_v11 = vpop.f32.mrb[32].mxu1  ;;  %v639_v25 = vadd.f32 %v4455_v49, %v566_v44  ;;  %vm4556_vm5 = vcmp.lt.s32.totalorder %v847_v43, 64 }
 0x123   :  { %v4531_v36 = vadd.f32 %v3493_v11, %v706_v22  ;;  %v762_v46 = vpop.f32.mrb[33].mxu1  ;;  %v4534_v37 = vadd.f32 %v4457_v50, %v568_v2 }
 0x124   :  { %v4536_v40 = vadd.f32 %v762_v46, %v698_v13  ;;  %v3494_v48 = vpop.f32.mrb[34].mxu1  ;;  %v725_v46 = vadd.f32 %v3405_v42, %v4483_v7 }
 0x125   :  { %v4538_v47 = vadd.f32 %v3494_v48, %v709_v33  ;;  %v765_v51 = vpop.f32.mrb[35].mxu1  ;;  %v571_v3 = vpop.f32.mrb[8].mxu0 }
 0x126   :  { %v4541_v0 = vadd.f32 %v765_v51, %v4486_v8  ;;  %v572_v49 = vadd.f32 %v571_v3, %v4490_v38  ;;  %v573_v22 = vpop.f32.mrb[9].mxu0 }
 0x127   :  { %v574_v44 = vadd.f32 %v573_v22, %v4492_v45  ;;  %v575_v61 = vpop.f32.mrb[10].mxu0 }
 0x128   :  { %v645_v50 = vadd.f32 %v4463_v52, %v572_v49  ;;  %v576_v33 = vadd.f32 %v575_v61, %v4490_v38  ;;  %v577_v2 = vpop.f32.mrb[11].mxu0 }
 0x129   :  { %v4553_v8 = vadd.f32 %v4466_v53, %v574_v44  ;;  %v578_v11 = vadd.f32 %v577_v2, %v4492_v45 }
 0x12a   :  { %v3497_v13 = vpop.f32.mrb[36].mxu1  ;;  %v649_v52 = vadd.f32 %v4468_v54, %v576_v33  ;;  %v4566_v62 = vsel %vm865_vm3, %v639_v25, %v645_v50  ;;  %v4570_v53 = vsel %vm865_vm3, %v645_v50, %v639_v25 }
 0x12b   :  { %v4562_v48 = vadd.f32 %v3497_v13, %v722_v41  ;;  %v778_v51 = vpop.f32.mrb[37].mxu1  ;;  %v4573_v3 = vadd.f32 %v4470_v55, %v578_v11 }
 0x12c   :  { %v4576_v43 = vadd.f32 %v778_v51, %v4495_v63  ;;  %v3498_v7 = vpop.f32.mrb[38].mxu1  ;;  %v4598_v49 = vsel %vm865_vm3, %v635_v4, %v649_v52 }
 0x12d   :  { %v1399_v55 = vsel %vm4556_vm5, %v4541_v0, %v4562_v48  ;;  %v4594_v41 = vadd.f32 %v3498_v7, %v725_v46  ;;  %v781_v25 = vpop.f32.mrb[39].mxu1  ;;  %v581_v50 = vpop.f32.mrb[12].mxu0  ;;  %v4626_v46 = vsel %vm865_vm3, %v649_v52, %v635_v4 }
 0x12e   :  { %v4609_v61 = vadd.f32 %v781_v25, %v4500_v6  ;;  %v582_v13 = vadd.f32 %v581_v50, %v4490_v38  ;;  %v583_v6 = vpop.f32.mrb[13].mxu0 }
 0x12f   :  { %v1118_v2 = vsel %vm4556_vm5, %v4536_v40, %v4594_v41  ;;  %v584_v25 = vadd.f32 %v583_v6, %v4492_v45  ;;  %v585_v11 = vpop.f32.mrb[14].mxu0 }
 0x130   :  { %v655_v4 = vadd.f32 %v4472_v56, %v582_v13  ;;  %v586_v52 = vadd.f32 %v585_v11, %v4490_v38  ;;  %v587_v63 = vpop.f32.mrb[15].mxu0 }
 0x131   :  { %v4644_v44 = vadd.f32 %v4474_v58, %v584_v25  ;;  %v588_v42 = vadd.f32 %v587_v63, %v4492_v45 }
 0x132   :  { %v659_v7 = vadd.f32 %v4476_v59, %v586_v52  ;;  %v4651_v6 = vsel %vm865_vm3, %v4511_v19, %v655_v4  ;;  %v4656_v50 = vsel %vm865_vm3, %v655_v4, %v4511_v19 }
 0x133   :  { %v4659_v56 = vadd.f32 %v4478_v60, %v588_v42  ;;  %v1398_v58 = vsel %vm4548_vm4, %v4514_v28, %v4644_v44 }
 0x134   :  { %v1116_v38 = vsel %vm865_vm3, %v4503_v9, %v659_v7  ;;  %v4675_v45 = vsel %vm865_vm3, %v659_v7, %v4503_v9 }
 0x135   :  { %v1117_v60 = vsel %vm4548_vm4, %v4507_v12, %v4659_v56  ;;  %v3048_v19 = vsel %vm4548_vm4, %v4659_v56, %v4507_v12  ;;  %v1104_v42 = vpop.f32.mrb[16].mxu0 }
 0x136   :  { %v3517_v63 = vpop.f32.mrb[17].mxu0 }
 0x137   :  { %v1107_v11 = vpop.f32.mrb[18].mxu0  ;;  %v4688_v63 = vld [vmem:[%s5257_s4] ss:$0 sm:$0xff] }
 0x138   :  { %v3518_v13 = vpop.f32.mrb[19].mxu0 }
 0x142   :  { %v1063_v25 = vpop.f32.mrb[40].mxu1 }
 0x143   :  { %v1119_v4 = vadd.f32 %v1116_v38, %v1063_v25  ;;  %v1065_v52 = vpop.f32.mrb[41].mxu1  ;;  %v1139_v38 = vadd.f32 %v4688_v63, %v1104_v42 }
 0x144   :  { %v1126_v39 = vadd.f32 %v1117_v60, %v1065_v52  ;;  %v1067_v9 = vpop.f32.mrb[42].mxu1 }
 0x145   :  { %v3181_v7 = vmul.f32 -1.442695, %v1119_v4  ;;  %v1068_v59 = vpop.f32.mrb[43].mxu1 }
 0x146   :  { %v3182_v22 = vmul.f32 -1.442695, %v1126_v39 }
 0x147   :  { %3899 = vpow2.f32 %v3181_v7 }
 0x148   :  { %3901 = vpow2.f32 %v3182_v22 }
 0x151   :  { %v3900_v54 = vpop.eup %3899 }
 0x152   :  { %v1123_v51 = vadd.f32 1.0, %v3900_v54  ;;  %v3902_v33 = vpop.eup %3901 }
 0x153   :  { %v1130_v11 = vadd.f32 1.0, %v3902_v33 }
 0x154   :  { %3903 = vrcp.f32 %v1123_v51 }
 0x155   :  { %3905 = vrcp.f32 %v1130_v11 }
 0x15e   :  { %v3904_v13 = vpop.eup %3903 }
 0x15f   :  { %v1140_v60 = vmul.f32 %v3904_v13, %v1139_v38  ;;  %v3906_v59 = vpop.eup %3905 }
 0x160   :  { %v1143_v4 = vsub.f32 1.0, %v3906_v59  ;;  %v1145_v54 = vmul.f32 %v3906_v59, %v4358_v29 }
 0x161   :  { %v1141_v25 = vadd.f32 %v1140_v60, %v1118_v2 }
 0x163   :  { %3907 = vtanh.f32 %v1141_v25 }
 0x16d   :  { %v3908_v22 = vpop.eup %3907 }
 0x16e   :  { %v1144_v51 = vmul.f32 %v3908_v22, %v1143_v4 }
 0x170   :  { %v4692_v52 = vadd.f32 %v1145_v54, %v1144_v51 }
 0x172   :  { %1147 = vst [vmem:[%s5258_s6] sm:$0xff] %v4692_v52  ;;  %1148 = vst [vmem:[%s5258_s6 + $0x78] sm:$0xff] %v4692_v52  ;;  %v1149_v33 = vpack.c.bf16 %v4692_v52, %v4692_v52 }
 0x174   :  { %1343 = vmatmul.mubr.bf16.vlgmr.msra.gmra.mrb[44].mxu1 %v1149_v33  ;;  %3536 = vmatmul.mubr.bf16.vlgmr.msra.gmra.mrb[20].mxu0 %v1149_v33 }
 0x175   :  { %1586 = vmatpush1.bf16.msra.mxu1 %v4272_v15  ;;  %1617 = vmatprep.mubr.bf16.mxu1 %v3980_v1  ;;  %v3827_v15 = vld [vmem:[%s5254_s3 + $0x8] ss:$12 sps:$4 sm:$0xff]  }
 0x176   :  { %1587 = vmatprep.subr.bf16.mxu1 %v4277_v16  ;;  %3555 = vmatprep.mubr.msk.bf16.mxu0 %vm3982_vm2, %v3981_v10  ;;  %v3828_v16 = vld [vmem:[%s5254_s3 + $0x20] ss:$12 sps:$4 sm:$0xff]  }
 0x177   :  { %3540 = vmatpush3.bf16.msra.mxu0 %v3827_v15  ;;  %v4790_v15 = vld [vmem:[%s5254_s3] ss:$12 sps:$4 sm:$0xff]  }
 0x178   :  { %3541 = vmatprep.subr.bf16.mxu0 %v3981_v10 }
 0x179   :  { %1588 = vmatpush1.bf16.msra.mxu1 %v4286_v17  ;;  %v3829_v17 = vld [vmem:[%s5254_s3 + $0x38] ss:$12 sps:$4 sm:$0xff]  }
 0x17a   :  { %1589 = vmatprep.subr.bf16.mxu1 %v4293_v18  ;;  %v3830_v18 = vld [vmem:[%s5254_s3 + $0x50] ss:$12 sps:$4 sm:$0xff]  }
 0x17b   :  { %3542 = vmatpush3.bf16.msra.mxu0 %v3828_v16  ;;  %v3838_v16 = vld [vmem:[%s5254_s3 + $0x8] ss:$12 sps:$4 sm:$0xff]  }
 0x17c   :  { %3543 = vmatprep.subr.bf16.mxu0 %v3981_v10 }
 0x17d   :  { %1590 = vmatpush1.bf16.msra.mxu1 %v4305_v20  ;;  %v3831_v20 = vld [vmem:[%s5254_s3 + $0x68] ss:$12 sps:$4 sm:$0xff]  }
 0x17e   :  { %1591 = vmatprep.subr.bf16.mxu1 %v4311_v21  ;;  %v3832_v21 = vld [vmem:[%s5254_s3 + $0x80] ss:$12 sps:$4 sm:$0xff]  }
 0x17f   :  { %3544 = vmatpush3.bf16.msra.mxu0 %v3829_v17  ;;  %v4800_v17 = vld [vmem:[%s5254_s3 + $0x1c] ss:$12 sps:$4 sm:$0xff]  }
 0x180   :  { %3545 = vmatprep.subr.bf16.mxu0 %v3981_v10 }
 0x181   :  { %1592 = vmatpush1.bf16.msra.mxu1 %v4321_v23  ;;  %v3833_v23 = vld [vmem:[%s5254_s3 + $0x98] ss:$12 sps:$4 sm:$0xff]  }
 0x182   :  { %1593 = vmatprep.subr.bf16.mxu1 %v4329_v24  ;;  %v3834_v24 = vld [vmem:[%s5254_s3 + $0xb0] ss:$12 sps:$4 sm:$0xff]  }
 0x183   :  { %3546 = vmatpush3.bf16.msra.mxu0 %v3830_v18  ;;  %v4806_v18 = vld [vmem:[%s5254_s3 + $0x18] ss:$12 sps:$4 sm:$0xff]  }
 0x184   :  { %3547 = vmatprep.subr.bf16.mxu0 %v3981_v10 }
 0x185   :  { %1594 = vmatpush1.bf16.msra.mxu1 %v4340_v26 }
 0x186   :  { %1595 = vmatprep.subr.bf16.mxu1 %v4346_v27 }
 0x187   :  { %3548 = vmatpush3.bf16.msra.mxu0 %v3831_v20  ;;  %v3842_v20 = vld [vmem:[%s5254_s3 + $0x20] ss:$12 sps:$4 sm:$0xff]  }
 0x188   :  { %3549 = vmatprep.subr.bf16.mxu0 %v3981_v10 }
 0x189   :  { %1596 = vmatpush1.bf16.msra.mxu1 %v4363_v30 }
 0x18a   :  { %1597 = vmatprep.subr.bf16.mxu1 %v4369_v31 }
 0x18b   :  { %3550 = vmatpush3.bf16.msra.mxu0 %v3832_v21  ;;  %v4816_v21 = vld [vmem:[%s5254_s3 + $0x34] ss:$12 sps:$4 sm:$0xff]  }
 0x18c   :  { %3551 = vmatprep.subr.bf16.mxu0 %v3981_v10 }
 0x18d   :  { %1598 = vmatpush1.bf16.msra.mxu1 %v4376_v32 }
 0x18e   :  { %1599 = vmatprep.subr.bf16.mxu1 %v4384_v34 }
 0x18f   :  { %3552 = vmatpush3.bf16.msra.mxu0 %v3833_v23  ;;  %v4822_v23 = vld [vmem:[%s5254_s3 + $0x30] ss:$12 sps:$4 sm:$0xff]  }
 0x190   :  { %3553 = vmatprep.subr.bf16.mxu0 %v3981_v10 }
 0x191   :  { %1600 = vmatpush1.bf16.msra.mxu1 %v4393_v35 }
 0x193   :  { %3554 = vmatpush3.bf16.msra.mxu0 %v3834_v24  ;;  %v3846_v24 = vld [vmem:[%s5254_s3 + $0x38] ss:$12 sps:$4 sm:$0xff]  }
 0x194   :  { %3559 = vmatprep.subr.bf16.mxu0 %v3981_v10 }
 0x247   :  { %v1344_v26 = vpop.f32.mrb[44].mxu1  ;;  %v1385_v27 = vpop.f32.mrb[20].mxu0 }
 0x248   :  { %v1400_v29 = vadd.f32 %v4651_v6, %v1344_v26  ;;  %v1346_v30 = vpop.f32.mrb[45].mxu1  ;;  %v3537_v31 = vpop.f32.mrb[21].mxu0  ;;  %v1414_v13 = vadd.f32 %v4688_v63, %v1385_v27  ;;  %v4832_v26 = vld [vmem:[%s5254_s3 + $0x4c] ss:$12 sps:$4 sm:$0xff]   ;;  %v4838_v27 = vld [vmem:[%s5254_s3 + $0x48] ss:$12 sps:$4 sm:$0xff]  }
 0x249   :  { %v1407_v32 = vadd.f32 %v1398_v58, %v1346_v30  ;;  %v1348_v34 = vpop.f32.mrb[46].mxu1  ;;  %v1388_v35 = vpop.f32.mrb[22].mxu0  ;;  %v4848_v30 = vld [vmem:[%s5254_s3 + $0x64] ss:$12 sps:$4 sm:$0xff]   ;;  %v4854_v31 = vld [vmem:[%s5254_s3 + $0x60] ss:$12 sps:$4 sm:$0xff]  }
 0x24a   :  { %v3208_v2 = vmul.f32 -1.442695, %v1400_v29  ;;  %v1349_v42 = vpop.f32.mrb[47].mxu1  ;;  %v3538_v39 = vpop.f32.mrb[23].mxu0  ;;  %v3850_v29 = vld [vmem:[%s5254_s3 + $0x50] ss:$12 sps:$4 sm:$0xff]  }
 0x24b   :  { %v3209_v9 = vmul.f32 -1.442695, %v1407_v32  ;;  %v3854_v32 = vld [vmem:[%s5254_s3 + $0x68] ss:$12 sps:$4 sm:$0xff]   ;;  %v4869_v35 = vld [vmem:[%s5254_s3 + $0x78] ss:$12 sps:$4 sm:$0xff]  }
 0x24c   :  { %3909 = vpow2.f32 %v3208_v2  ;;  %v4863_v34 = vld [vmem:[%s5254_s3 + $0x7c] ss:$12 sps:$4 sm:$0xff]   ;;  %v3858_v2 = vld [vmem:[%s5254_s3 + $0x80] ss:$12 sps:$4 sm:$0xff]  }
 0x24d   :  { %3911 = vpow2.f32 %v3209_v9  ;;  %v4879_v42 = vld [vmem:[%s5254_s3 + $0x94] ss:$12 sps:$4 sm:$0xff]   ;;  %v4885_v39 = vld [vmem:[%s5254_s3 + $0x90] ss:$12 sps:$4 sm:$0xff]   ;;  %v3862_v9 = vld [vmem:[%s5254_s3 + $0x98] ss:$12 sps:$4 sm:$0xff]  }
 0x256   :  { %v3910_v7 = vpop.eup %3909 }
 0x257   :  { %v1404_v11 = vadd.f32 1.0, %v3910_v7  ;;  %v3912_v6 = vpop.eup %3911  ;;  %v4895_v7 = vld [vmem:[%s5254_s3 + $0xac] ss:$12 sps:$4 sm:$0xff]  }
 0x258   :  { %v1411_v38 = vadd.f32 1.0, %v3912_v6  ;;  %v3866_v6 = vld [vmem:[%s5254_s3 + $0xb0] ss:$12 sps:$4 sm:$0xff]  }
 0x259   :  { %3913 = vrcp.f32 %v1404_v11  ;;  %v4901_v11 = vld [vmem:[%s5254_s3 + $0xa8] ss:$12 sps:$4 sm:$0xff]  }
 0x25a   :  { %3915 = vrcp.f32 %v1411_v38 }
 0x263   :  { %v3914_v60 = vpop.eup %3913 }
 0x264   :  { %v1415_v25 = vmul.f32 %v3914_v60, %v1414_v13  ;;  %v3916_v59 = vpop.eup %3915 }
 0x265   :  { %v1418_v4 = vsub.f32 1.0, %v3916_v59  ;;  %v1420_v54 = vmul.f32 %v3916_v59, %v4692_v52  ;;  %v4785_v52 = vld [vmem:[%s5254_s3 + $0x4] ss:$12 sps:$4 sm:$0xff]   ;;  %v5263_v59 = vsel %vm4548_vm4, %v4525_v57, %v4573_v3 }
 0x266   :  { %v1416_v58 = vadd.f32 %v1415_v25, %v1399_v55  ;;  %1860 = vmatprep.subr.bf16.mxu1 %v4785_v52 }
 0x268   :  { %3917 = vtanh.f32 %v1416_v58 }
 0x272   :  { %v3918_v22 = vpop.eup %3917 }
 0x273   :  { %v1419_v51 = vmul.f32 %v3918_v22, %v1418_v4 }
 0x275   :  { %v4767_v33 = vadd.f32 %v1420_v54, %v1419_v51 }
 0x277   :  { %1422 = vst [vmem:[%s5258_s6 + $0x10] sm:$0xff] %v4767_v33  ;;  %1423 = vst [vmem:[%s5258_s6 + $0x68] sm:$0xff] %v4767_v33  ;;  %v1424_v55 = vpack.c.bf16 %v4767_v33, %v4767_v33 }
 0x279   :  { %1618 = vmatmul.mubr.bf16.vlgmr.msra.gmra.mrb[48].mxu1 %v1424_v55  ;;  %3556 = vmatmul.mubr.bf16.vlgmr.msra.gmra.mrb[24].mxu0 %v1424_v55 }
 0x27a   :  { %1892 = vmatprep.mubr.bf16.mxu1 %v3980_v1  ;;  %3575 = vmatprep.mubr.msk.bf16.mxu0 %vm3982_vm2, %v3981_v10 }
 0x27b   :  { %1861 = vmatpush1.bf16.msra.mxu1 %v4790_v15  ;;  %3560 = vmatpush3.bf16.msra.mxu0 %v3838_v16 }
 0x27c   :  { %3561 = vmatprep.subr.bf16.mxu0 %v3981_v10  ;;  %1862 = vmatprep.subr.bf16.mxu1 %v4800_v17 }
 0x27f   :  { %1863 = vmatpush1.bf16.msra.mxu1 %v4806_v18  ;;  %3562 = vmatpush3.bf16.msra.mxu0 %v3842_v20 }
 0x280   :  { %3563 = vmatprep.subr.bf16.mxu0 %v3981_v10  ;;  %1864 = vmatprep.subr.bf16.mxu1 %v4816_v21 }
 0x283   :  { %1865 = vmatpush1.bf16.msra.mxu1 %v4822_v23  ;;  %3564 = vmatpush3.bf16.msra.mxu0 %v3846_v24 }
 0x284   :  { %3565 = vmatprep.subr.bf16.mxu0 %v3981_v10  ;;  %1866 = vmatprep.subr.bf16.mxu1 %v4832_v26 }
 0x287   :  { %1867 = vmatpush1.bf16.msra.mxu1 %v4838_v27  ;;  %3566 = vmatpush3.bf16.msra.mxu0 %v3850_v29 }
 0x288   :  { %3567 = vmatprep.subr.bf16.mxu0 %v3981_v10  ;;  %1868 = vmatprep.subr.bf16.mxu1 %v4848_v30 }
 0x28b   :  { %1869 = vmatpush1.bf16.msra.mxu1 %v4854_v31  ;;  %3568 = vmatpush3.bf16.msra.mxu0 %v3854_v32 }
 0x28c   :  { %1870 = vmatprep.subr.bf16.mxu1 %v4863_v34  ;;  %3569 = vmatprep.subr.bf16.mxu0 %v3981_v10 }
 0x28f   :  { %1871 = vmatpush1.bf16.msra.mxu1 %v4869_v35  ;;  %3570 = vmatpush3.bf16.msra.mxu0 %v3858_v2 }
 0x290   :  { %1872 = vmatprep.subr.bf16.mxu1 %v4879_v42  ;;  %3571 = vmatprep.subr.bf16.mxu0 %v3981_v10 }
 0x293   :  { %1873 = vmatpush1.bf16.msra.mxu1 %v4885_v39  ;;  %3572 = vmatpush3.bf16.msra.mxu0 %v3862_v9 }
 0x294   :  { %1874 = vmatprep.subr.bf16.mxu1 %v4895_v7  ;;  %3573 = vmatprep.subr.bf16.mxu0 %v3981_v10 }
 0x297   :  { %1875 = vmatpush1.bf16.msra.mxu1 %v4901_v11  ;;  %3574 = vmatpush3.bf16.msra.mxu0 %v3866_v6 }
 0x298   :  { %2135 = vmatprep.subr.bf16.mxu1 %v4785_v52  ;;  %3579 = vmatprep.subr.bf16.mxu0 %v3981_v10 }
 0x34c   :  { %v1619_v38 = vpop.f32.mrb[48].mxu1  ;;  %v1660_v13 = vpop.f32.mrb[24].mxu0 }
 0x34d   :  { %v1675_v60 = vadd.f32 %v4598_v49, %v1619_v38  ;;  %v1621_v25 = vpop.f32.mrb[49].mxu1  ;;  %v3557_v58 = vpop.f32.mrb[25].mxu0  ;;  %v1689_v2 = vadd.f32 %v4688_v63, %v1660_v13  ;;  %v5264_v38 = vsel %vm4556_vm5, %v4531_v36, %v4609_v61 }
 0x34e   :  { %v1682_v4 = vadd.f32 %v5263_v59, %v1621_v25  ;;  %v1623_v22 = vpop.f32.mrb[50].mxu1  ;;  %v1663_v54 = vpop.f32.mrb[26].mxu0 }
 0x34f   :  { %v3234_v51 = vmul.f32 -1.442695, %v1675_v60  ;;  %v1624_v55 = vpop.f32.mrb[51].mxu1  ;;  %v3558_v16 = vpop.f32.mrb[27].mxu0 }
 0x350   :  { %v3235_v20 = vmul.f32 -1.442695, %v1682_v4  ;;  %v3869_v55 = vld [vmem:[%s5254_s3 + $0x38] ss:$12 sps:$4 sm:$0xff]   ;;  %v3870_v16 = vld [vmem:[%s5254_s3 + $0x50] ss:$12 sps:$4 sm:$0xff]  }
 0x351   :  { %3919 = vpow2.f32 %v3234_v51  ;;  %v3868_v51 = vld [vmem:[%s5254_s3 + $0x20] ss:$12 sps:$4 sm:$0xff]  }
 0x352   :  { %3921 = vpow2.f32 %v3235_v20  ;;  %v3871_v20 = vld [vmem:[%s5254_s3 + $0x68] ss:$12 sps:$4 sm:$0xff]  }
 0x35b   :  { %v3920_v24 = vpop.eup %3919 }
 0x35c   :  { %v1679_v29 = vadd.f32 1.0, %v3920_v24  ;;  %v3922_v49 = vpop.eup %3921  ;;  %v3872_v24 = vld [vmem:[%s5254_s3 + $0x80] ss:$12 sps:$4 sm:$0xff]  }
 0x35d   :  { %v1686_v32 = vadd.f32 1.0, %v3922_v49  ;;  %v3874_v49 = vld [vmem:[%s5254_s3 + $0xb0] ss:$12 sps:$4 sm:$0xff]  }
 0x35e   :  { %3923 = vrcp.f32 %v1679_v29  ;;  %v3873_v29 = vld [vmem:[%s5254_s3 + $0x98] ss:$12 sps:$4 sm:$0xff]  }
 0x35f   :  { %3925 = vrcp.f32 %v1686_v32 }
 0x368   :  { %v3924_v9 = vpop.eup %3923 }
 0x369   :  { %v1690_v6 = vmul.f32 %v3924_v9, %v1689_v2  ;;  %v3926_v25 = vpop.eup %3925 }
 0x36a   :  { %v1693_v58 = vsub.f32 1.0, %v3926_v25  ;;  %v1695_v4 = vmul.f32 %v3926_v25, %v4767_v33  ;;  %v3867_v33 = vld [vmem:[%s5254_s3 + $0x8] ss:$12 sps:$4 sm:$0xff]  }
 0x36b   :  { %v1691_v60 = vadd.f32 %v1690_v6, %v5264_v38 }
 0x36d   :  { %3927 = vtanh.f32 %v1691_v60  ;;  %v5265_v60 = vsel %vm4548_vm4, %v4534_v37, %v4553_v8 }
 0x377   :  { %v3928_v59 = vpop.eup %3927 }
 0x378   :  { %v1694_v22 = vmul.f32 %v3928_v59, %v1693_v58 }
 0x37a   :  { %v4924_v54 = vadd.f32 %v1695_v4, %v1694_v22 }
 0x37c   :  { %1697 = vst [vmem:[%s5258_s6 + $0x20] sm:$0xff] %v4924_v54  ;;  %1698 = vst [vmem:[%s5258_s6 + $0x58] sm:$0xff] %v4924_v54  ;;  %v1699_v13 = vpack.c.bf16 %v4924_v54, %v4924_v54 }
 0x37e   :  { %1893 = vmatmul.mubr.bf16.vlgmr.msra.gmra.mrb[52].mxu1 %v1699_v13  ;;  %3576 = vmatmul.mubr.bf16.vlgmr.msra.gmra.mrb[28].mxu0 %v1699_v13 }
 0x37f   :  { %2136 = vmatpush1.bf16.msra.mxu1 %v4790_v15  ;;  %2167 = vmatprep.mubr.bf16.mxu1 %v3980_v1 }
 0x380   :  { %2137 = vmatprep.subr.bf16.mxu1 %v4800_v17  ;;  %3595 = vmatprep.mubr.msk.bf16.mxu0 %vm3982_vm2, %v3981_v10 }
 0x381   :  { %3580 = vmatpush3.bf16.msra.mxu0 %v3867_v33 }
 0x382   :  { %3581 = vmatprep.subr.bf16.mxu0 %v3981_v10 }
 0x383   :  { %2138 = vmatpush1.bf16.msra.mxu1 %v4806_v18 }
 0x384   :  { %2139 = vmatprep.subr.bf16.mxu1 %v4816_v21 }
 0x385   :  { %3582 = vmatpush3.bf16.msra.mxu0 %v3868_v51 }
 0x386   :  { %3583 = vmatprep.subr.bf16.mxu0 %v3981_v10 }
 0x387   :  { %2140 = vmatpush1.bf16.msra.mxu1 %v4822_v23 }
 0x388   :  { %2141 = vmatprep.subr.bf16.mxu1 %v4832_v26 }
 0x389   :  { %3584 = vmatpush3.bf16.msra.mxu0 %v3869_v55 }
 0x38a   :  { %3585 = vmatprep.subr.bf16.mxu0 %v3981_v10 }
 0x38b   :  { %2142 = vmatpush1.bf16.msra.mxu1 %v4838_v27 }
 0x38c   :  { %2143 = vmatprep.subr.bf16.mxu1 %v4848_v30 }
 0x38d   :  { %3586 = vmatpush3.bf16.msra.mxu0 %v3870_v16 }
 0x38e   :  { %3587 = vmatprep.subr.bf16.mxu0 %v3981_v10 }
 0x38f   :  { %2144 = vmatpush1.bf16.msra.mxu1 %v4854_v31 }
 0x390   :  { %2145 = vmatprep.subr.bf16.mxu1 %v4863_v34 }
 0x391   :  { %3588 = vmatpush3.bf16.msra.mxu0 %v3871_v20 }
 0x392   :  { %3589 = vmatprep.subr.bf16.mxu0 %v3981_v10 }
 0x393   :  { %2146 = vmatpush1.bf16.msra.mxu1 %v4869_v35 }
 0x394   :  { %2147 = vmatprep.subr.bf16.mxu1 %v4879_v42 }
 0x395   :  { %3590 = vmatpush3.bf16.msra.mxu0 %v3872_v24 }
 0x396   :  { %3591 = vmatprep.subr.bf16.mxu0 %v3981_v10 }
 0x397   :  { %2148 = vmatpush1.bf16.msra.mxu1 %v4885_v39 }
 0x398   :  { %2149 = vmatprep.subr.bf16.mxu1 %v4895_v7 }
 0x399   :  { %3592 = vmatpush3.bf16.msra.mxu0 %v3873_v29 }
 0x39a   :  { %3593 = vmatprep.subr.bf16.mxu0 %v3981_v10 }
 0x39b   :  { %2150 = vmatpush1.bf16.msra.mxu1 %v4901_v11 }
 0x39c   :  { %2410 = vmatprep.subr.bf16.mxu1 %v4785_v52 }
 0x39d   :  { %3594 = vmatpush3.bf16.msra.mxu0 %v3874_v49  ;;  %v5266_v49 = vsel %vm4556_vm5, %v4538_v47, %v4576_v43 }
 0x39e   :  { %3599 = vmatprep.subr.bf16.mxu0 %v3981_v10 }
 0x451   :  { %v1894_v32 = vpop.f32.mrb[52].mxu1  ;;  %v1935_v2 = vpop.f32.mrb[28].mxu0 }
 0x452   :  { %v1950_v9 = vadd.f32 %v4566_v62, %v1894_v32  ;;  %v1896_v6 = vpop.f32.mrb[53].mxu1  ;;  %v3577_v38 = vpop.f32.mrb[29].mxu0  ;;  %v1964_v20 = vadd.f32 %v4688_v63, %v1935_v2 }
 0x453   :  { %v1957_v25 = vadd.f32 %v5265_v60, %v1896_v6  ;;  %v1898_v58 = vpop.f32.mrb[54].mxu1  ;;  %v1938_v59 = vpop.f32.mrb[30].mxu0 }
 0x454   :  { %v3260_v4 = vmul.f32 -1.442695, %v1950_v9  ;;  %v1899_v22 = vpop.f32.mrb[55].mxu1  ;;  %v3578_v13 = vpop.f32.mrb[31].mxu0  ;;  %v3876_v59 = vld [vmem:[%s5254_s3 + $0x20] ss:$12 sps:$4 sm:$0xff]  }
 0x455   :  { %v3261_v33 = vmul.f32 -1.442695, %v1957_v25  ;;  %v3878_v22 = vld [vmem:[%s5254_s3 + $0x50] ss:$12 sps:$4 sm:$0xff]   ;;  %v3879_v13 = vld [vmem:[%s5254_s3 + $0x68] ss:$12 sps:$4 sm:$0xff]  }
 0x456   :  { %3929 = vpow2.f32 %v3260_v4  ;;  %v3877_v4 = vld [vmem:[%s5254_s3 + $0x38] ss:$12 sps:$4 sm:$0xff]  }
 0x457   :  { %3931 = vpow2.f32 %v3261_v33  ;;  %v3880_v33 = vld [vmem:[%s5254_s3 + $0x80] ss:$12 sps:$4 sm:$0xff]  }
 0x460   :  { %v3930_v51 = vpop.eup %3929 }
 0x461   :  { %v1954_v55 = vadd.f32 1.0, %v3930_v51  ;;  %v3932_v62 = vpop.eup %3931  ;;  %v3881_v51 = vld [vmem:[%s5254_s3 + $0x98] ss:$12 sps:$4 sm:$0xff]  }
 0x462   :  { %v1961_v16 = vadd.f32 1.0, %v3932_v62 }
 0x463   :  { %3933 = vrcp.f32 %v1954_v55  ;;  %v3882_v55 = vld [vmem:[%s5254_s3 + $0xb0] ss:$12 sps:$4 sm:$0xff]  }
 0x464   :  { %3935 = vrcp.f32 %v1961_v16 }
 0x46d   :  { %v3934_v24 = vpop.eup %3933 }
 0x46e   :  { %v1965_v29 = vmul.f32 %v3934_v24, %v1964_v20  ;;  %v3936_v9 = vpop.eup %3935 }
 0x46f   :  { %v1968_v6 = vsub.f32 1.0, %v3936_v9  ;;  %v1970_v60 = vmul.f32 %v3936_v9, %v4924_v54  ;;  %v3875_v54 = vld [vmem:[%s5254_s3 + $0x8] ss:$12 sps:$4 sm:$0xff]  }
 0x470   :  { %v1966_v32 = vadd.f32 %v1965_v29, %v5266_v49  ;;  %v5267_v49 = vsel %vm4548_vm4, %v4553_v8, %v4534_v37  ;;  %v5268_v37 = vsel %vm4556_vm5, %v4576_v43, %v4538_v47  ;;  %v3883_v43 = vld [vmem:[%s5254_s3 + $0x8] ss:$12 sps:$4 sm:$0xff]  }
 0x472   :  { %3937 = vtanh.f32 %v1966_v32 }
 0x47c   :  { %v3938_v38 = vpop.eup %3937 }
 0x47d   :  { %v1969_v25 = vmul.f32 %v3938_v38, %v1968_v6 }
 0x47f   :  { %v5000_v58 = vadd.f32 %v1970_v60, %v1969_v25 }
 0x481   :  { %1972 = vst [vmem:[%s5258_s6 + $0x30] sm:$0xff] %v5000_v58  ;;  %1973 = vst [vmem:[%s5258_s6 + $0x48] sm:$0xff] %v5000_v58  ;;  %v1974_v2 = vpack.c.bf16 %v5000_v58, %v5000_v58 }
 0x483   :  { %2168 = vmatmul.mubr.bf16.vlgmr.msra.gmra.mrb[56].mxu1 %v1974_v2  ;;  %3596 = vmatmul.mubr.bf16.vlgmr.msra.gmra.mrb[32].mxu0 %v1974_v2 }
 0x484   :  { %2411 = vmatpush1.bf16.msra.mxu1 %v4790_v15  ;;  %2442 = vmatprep.mubr.bf16.mxu1 %v3980_v1 }
 0x485   :  { %2412 = vmatprep.subr.bf16.mxu1 %v4800_v17  ;;  %3615 = vmatprep.mubr.msk.bf16.mxu0 %vm3982_vm2, %v3981_v10 }
 0x486   :  { %3600 = vmatpush3.bf16.msra.mxu0 %v3875_v54 }
 0x487   :  { %3601 = vmatprep.subr.bf16.mxu0 %v3981_v10 }
 0x488   :  { %2413 = vmatpush1.bf16.msra.mxu1 %v4806_v18 }
 0x489   :  { %2414 = vmatprep.subr.bf16.mxu1 %v4816_v21 }
 0x48a   :  { %3602 = vmatpush3.bf16.msra.mxu0 %v3876_v59 }
 0x48b   :  { %3603 = vmatprep.subr.bf16.mxu0 %v3981_v10 }
 0x48c   :  { %2415 = vmatpush1.bf16.msra.mxu1 %v4822_v23 }
 0x48d   :  { %2416 = vmatprep.subr.bf16.mxu1 %v4832_v26 }
 0x48e   :  { %3604 = vmatpush3.bf16.msra.mxu0 %v3877_v4 }
 0x48f   :  { %3605 = vmatprep.subr.bf16.mxu0 %v3981_v10 }
 0x490   :  { %2417 = vmatpush1.bf16.msra.mxu1 %v4838_v27 }
 0x491   :  { %2418 = vmatprep.subr.bf16.mxu1 %v4848_v30 }
 0x492   :  { %3606 = vmatpush3.bf16.msra.mxu0 %v3878_v22 }
 0x493   :  { %3607 = vmatprep.subr.bf16.mxu0 %v3981_v10 }
 0x494   :  { %2419 = vmatpush1.bf16.msra.mxu1 %v4854_v31 }
 0x495   :  { %2420 = vmatprep.subr.bf16.mxu1 %v4863_v34 }
 0x496   :  { %3608 = vmatpush3.bf16.msra.mxu0 %v3879_v13 }
 0x497   :  { %3609 = vmatprep.subr.bf16.mxu0 %v3981_v10 }
 0x498   :  { %2421 = vmatpush1.bf16.msra.mxu1 %v4869_v35 }
 0x499   :  { %2422 = vmatprep.subr.bf16.mxu1 %v4879_v42 }
 0x49a   :  { %3610 = vmatpush3.bf16.msra.mxu0 %v3880_v33 }
 0x49b   :  { %3611 = vmatprep.subr.bf16.mxu0 %v3981_v10 }
 0x49c   :  { %2423 = vmatpush1.bf16.msra.mxu1 %v4885_v39 }
 0x49d   :  { %2424 = vmatprep.subr.bf16.mxu1 %v4895_v7 }
 0x49e   :  { %3612 = vmatpush3.bf16.msra.mxu0 %v3881_v51 }
 0x49f   :  { %3613 = vmatprep.subr.bf16.mxu0 %v3981_v10 }
 0x4a0   :  { %2425 = vmatpush1.bf16.msra.mxu1 %v4901_v11 }
 0x4a1   :  { %2685 = vmatprep.subr.bf16.mxu1 %v4785_v52 }
 0x4a2   :  { %3614 = vmatpush3.bf16.msra.mxu0 %v3882_v55 }
 0x4a3   :  { %3619 = vmatprep.subr.bf16.mxu0 %v3981_v10 }
 0x556   :  { %v2169_v62 = vpop.f32.mrb[56].mxu1  ;;  %v2210_v16 = vpop.f32.mrb[32].mxu0 }
 0x557   :  { %v2225_v20 = vadd.f32 %v4570_v53, %v2169_v62  ;;  %v2171_v24 = vpop.f32.mrb[57].mxu1  ;;  %v3597_v29 = vpop.f32.mrb[33].mxu0  ;;  %v2239_v22 = vadd.f32 %v4688_v63, %v2210_v16  ;;  %v3885_v16 = vld [vmem:[%s5254_s3 + $0x38] ss:$12 sps:$4 sm:$0xff]  }
 0x558   :  { %v2232_v32 = vadd.f32 %v5267_v49, %v2171_v24  ;;  %v2173_v9 = vpop.f32.mrb[58].mxu1  ;;  %v2213_v6 = vpop.f32.mrb[34].mxu0  ;;  %v3887_v49 = vld [vmem:[%s5254_s3 + $0x68] ss:$12 sps:$4 sm:$0xff]  }
 0x559   :  { %v3286_v38 = vmul.f32 -1.442695, %v2225_v20  ;;  %v2174_v60 = vpop.f32.mrb[59].mxu1  ;;  %v3598_v25 = vpop.f32.mrb[35].mxu0  ;;  %v3889_v9 = vld [vmem:[%s5254_s3 + $0x98] ss:$12 sps:$4 sm:$0xff]  }
 0x55a   :  { %v3287_v2 = vmul.f32 -1.442695, %v2232_v32  ;;  %v3888_v32 = vld [vmem:[%s5254_s3 + $0x80] ss:$12 sps:$4 sm:$0xff]   ;;  %v3890_v6 = vld [vmem:[%s5254_s3 + $0xb0] ss:$12 sps:$4 sm:$0xff]  }
 0x55b   :  { %3939 = vpow2.f32 %v3286_v38 }
 0x55c   :  { %3941 = vpow2.f32 %v3287_v2 }
 0x565   :  { %v3940_v54 = vpop.eup %3939 }
 0x566   :  { %v2229_v59 = vadd.f32 1.0, %v3940_v54  ;;  %v3942_v53 = vpop.eup %3941 }
 0x567   :  { %v2236_v4 = vadd.f32 1.0, %v3942_v53 }
 0x568   :  { %3943 = vrcp.f32 %v2229_v59  ;;  %v5269_v59 = vsel %vm4548_vm4, %v4573_v3, %v4525_v57  ;;  %v5270_v57 = vsel %vm4556_vm5, %v4609_v61, %v4531_v36  ;;  %v3892_v61 = vld [vmem:[%s5254_s3 + $0x20] ss:$12 sps:$4 sm:$0xff]  }
 0x569   :  { %3945 = vrcp.f32 %v2236_v4 }
 0x572   :  { %v3944_v13 = vpop.eup %3943 }
 0x573   :  { %v2240_v33 = vmul.f32 %v3944_v13, %v2239_v22  ;;  %v3946_v51 = vpop.eup %3945 }
 0x574   :  { %v2243_v55 = vsub.f32 1.0, %v3946_v51  ;;  %v2245_v20 = vmul.f32 %v3946_v51, %v5000_v58  ;;  %v3884_v58 = vld [vmem:[%s5254_s3 + $0x20] ss:$12 sps:$4 sm:$0xff]  }
 0x575   :  { %v2241_v8 = vadd.f32 %v2240_v33, %v5268_v37 }
 0x577   :  { %3947 = vtanh.f32 %v2241_v8 }
 0x581   :  { %v3948_v62 = vpop.eup %3947 }
 0x582   :  { %v2244_v24 = vmul.f32 %v3948_v62, %v2243_v55 }
 0x584   :  { %v5076_v29 = vadd.f32 %v2245_v20, %v2244_v24 }
 0x586   :  { %2247 = vst [vmem:[%s5258_s6 + $0x40] sm:$0xff] %v5076_v29  ;;  %2248 = vst [vmem:[%s5258_s6 + $0x38] sm:$0xff] %v5076_v29  ;;  %v2249_v47 = vpack.c.bf16 %v5076_v29, %v5076_v29 }
 0x588   :  { %2443 = vmatmul.mubr.bf16.vlgmr.msra.gmra.mrb[60].mxu1 %v2249_v47  ;;  %3616 = vmatmul.mubr.bf16.vlgmr.msra.gmra.mrb[36].mxu0 %v2249_v47 }
 0x589   :  { %2686 = vmatpush1.bf16.msra.mxu1 %v4790_v15  ;;  %2717 = vmatprep.mubr.bf16.mxu1 %v3980_v1 }
 0x58a   :  { %2687 = vmatprep.subr.bf16.mxu1 %v4800_v17  ;;  %3635 = vmatprep.mubr.msk.bf16.mxu0 %vm3982_vm2, %v3981_v10 }
 0x58b   :  { %3620 = vmatpush3.bf16.msra.mxu0 %v3883_v43 }
 0x58c   :  { %3621 = vmatprep.subr.bf16.mxu0 %v3981_v10 }
 0x58d   :  { %2688 = vmatpush1.bf16.msra.mxu1 %v4806_v18 }
 0x58e   :  { %2689 = vmatprep.subr.bf16.mxu1 %v4816_v21 }
 0x58f   :  { %3622 = vmatpush3.bf16.msra.mxu0 %v3884_v58 }
 0x590   :  { %3623 = vmatprep.subr.bf16.mxu0 %v3981_v10 }
 0x591   :  { %2690 = vmatpush1.bf16.msra.mxu1 %v4822_v23 }
 0x592   :  { %2691 = vmatprep.subr.bf16.mxu1 %v4832_v26 }
 0x593   :  { %3624 = vmatpush3.bf16.msra.mxu0 %v3885_v16 }
 0x594   :  { %3625 = vmatprep.subr.bf16.mxu0 %v3981_v10 }
 0x595   :  { %2692 = vmatpush1.bf16.msra.mxu1 %v4838_v27 }
 0x596   :  { %2693 = vmatprep.subr.bf16.mxu1 %v4848_v30 }
 0x599   :  { %2694 = vmatpush1.bf16.msra.mxu1 %v4854_v31 }
 0x59a   :  { %2695 = vmatprep.subr.bf16.mxu1 %v4863_v34 }
 0x59d   :  { %2696 = vmatpush1.bf16.msra.mxu1 %v4869_v35 }
 0x59e   :  { %2697 = vmatprep.subr.bf16.mxu1 %v4879_v42 }
 0x5a1   :  { %2698 = vmatpush1.bf16.msra.mxu1 %v4885_v39 }
 0x5a2   :  { %2699 = vmatprep.subr.bf16.mxu1 %v4895_v7 }
 0x5a5   :  { %2700 = vmatpush1.bf16.msra.mxu1 %v4901_v11 }
 0x5a6   :  { %2960 = vmatprep.subr.bf16.mxu1 %v4785_v52  ;;  %v3886_v52 = vld [vmem:[%s5254_s3 + $0x50] ss:$12 sps:$4 sm:$0xff]  }
 0x5a7   :  { %3626 = vmatpush3.bf16.msra.mxu0 %v3886_v52 }
 0x5a8   :  { %3627 = vmatprep.subr.bf16.mxu0 %v3981_v10 }
 0x5ab   :  { %3628 = vmatpush3.bf16.msra.mxu0 %v3887_v49 }
 0x5ac   :  { %3629 = vmatprep.subr.bf16.mxu0 %v3981_v10 }
 0x5af   :  { %3630 = vmatpush3.bf16.msra.mxu0 %v3888_v32 }
 0x5b0   :  { %3631 = vmatprep.subr.bf16.mxu0 %v3981_v10 }
 0x5b3   :  { %3632 = vmatpush3.bf16.msra.mxu0 %v3889_v9 }
 0x5b4   :  { %3633 = vmatprep.subr.bf16.mxu0 %v3981_v10 }
 0x5b7   :  { %3634 = vmatpush3.bf16.msra.mxu0 %v3890_v6 }
 0x5b8   :  { %3639 = vmatprep.subr.bf16.mxu0 %v3981_v10 }
 0x65b   :  { %v2444_v38 = vpop.f32.mrb[60].mxu1  ;;  %v2485_v60 = vpop.f32.mrb[36].mxu0 }
 0x65c   :  { %v2500_v25 = vadd.f32 %v4626_v46, %v2444_v38  ;;  %v2446_v2 = vpop.f32.mrb[61].mxu1  ;;  %v3617_v54 = vpop.f32.mrb[37].mxu0  ;;  %v2514_v20 = vadd.f32 %v4688_v63, %v2485_v60 }
 0x65d   :  { %v2507_v53 = vadd.f32 %v5269_v59, %v2446_v2  ;;  %v2448_v4 = vpop.f32.mrb[62].mxu1  ;;  %v2488_v22 = vpop.f32.mrb[38].mxu0 }
 0x65e   :  { %v3312_v13 = vmul.f32 -1.442695, %v2500_v25  ;;  %v2449_v33 = vpop.f32.mrb[63].mxu1  ;;  %v3618_v37 = vpop.f32.mrb[39].mxu0 }
 0x65f   :  { %v3313_v8 = vmul.f32 -1.442695, %v2507_v53 }
 0x660   :  { %3949 = vpow2.f32 %v3312_v13 }
 0x661   :  { %3951 = vpow2.f32 %v3313_v8 }
 0x66a   :  { %v3950_v51 = vpop.eup %3949 }
 0x66b   :  { %v2504_v55 = vadd.f32 1.0, %v3950_v51  ;;  %v3952_v46 = vpop.eup %3951 }
 0x66c   :  { %v2511_v62 = vadd.f32 1.0, %v3952_v46 }
 0x66d   :  { %3953 = vrcp.f32 %v2504_v55 }
 0x66e   :  { %3955 = vrcp.f32 %v2511_v62 }
 0x677   :  { %v3954_v24 = vpop.eup %3953 }
 0x678   :  { %v2515_v47 = vmul.f32 %v3954_v24, %v2514_v20  ;;  %v3956_v43 = vpop.eup %3955 }
 0x679   :  { %v2518_v58 = vsub.f32 1.0, %v3956_v43  ;;  %v2520_v52 = vmul.f32 %v3956_v43, %v5076_v29 }
 0x67a   :  { %v2516_v3 = vadd.f32 %v2515_v47, %v5270_v57 }
 0x67c   :  { %3957 = vtanh.f32 %v2516_v3 }
 0x686   :  { %v3958_v16 = vpop.eup %3957 }
 0x687   :  { %v2519_v49 = vmul.f32 %v3958_v16, %v2518_v58 }
 0x689   :  { %v5152_v32 = vadd.f32 %v2520_v52, %v2519_v49 }
 0x68b   :  { %2522 = vst [vmem:[%s5258_s6 + $0x50] sm:$0xff] %v5152_v32  ;;  %2523 = vst [vmem:[%s5258_s6 + $0x28] sm:$0xff] %v5152_v32  ;;  %v2524_v36 = vpack.c.bf16 %v5152_v32, %v5152_v32 }
 0x68d   :  { %2718 = vmatmul.mubr.bf16.vlgmr.msra.gmra.mrb[64].mxu1 %v2524_v36  ;;  %3636 = vmatmul.mubr.bf16.vlgmr.msra.gmra.mrb[40].mxu0 %v2524_v36 }
 0x68e   :  { %2961 = vmatpush1.bf16.msra.mxu1 %v4790_v15  ;;  %2992 = vmatprep.mubr.bf16.mxu1 %v3980_v1  ;;  %v3891_v1 = vld [vmem:[%s5254_s3 + $0x8] ss:$12 sps:$4 sm:$0xff]   ;;  %v3893_v15 = vld [vmem:[%s5254_s3 + $0x38] ss:$12 sps:$4 sm:$0xff]  }
 0x68f   :  { %2962 = vmatprep.subr.bf16.mxu1 %v4800_v17  ;;  %3655 = vmatprep.mubr.msk.bf16.mxu0 %vm3982_vm2, %v3981_v10  ;;  %v3894_v17 = vld [vmem:[%s5254_s3 + $0x50] ss:$12 sps:$4 sm:$0xff]  }
 0x690   :  { %3640 = vmatpush3.bf16.msra.mxu0 %v3891_v1 }
 0x691   :  { %3641 = vmatprep.subr.bf16.mxu0 %v3981_v10 }
 0x692   :  { %2963 = vmatpush1.bf16.msra.mxu1 %v4806_v18  ;;  %v3895_v18 = vld [vmem:[%s5254_s3 + $0x68] ss:$12 sps:$4 sm:$0xff]  }
 0x693   :  { %2964 = vmatprep.subr.bf16.mxu1 %v4816_v21  ;;  %v3896_v21 = vld [vmem:[%s5254_s3 + $0x80] ss:$12 sps:$4 sm:$0xff]  }
 0x694   :  { %3642 = vmatpush3.bf16.msra.mxu0 %v3892_v61 }
 0x695   :  { %3643 = vmatprep.subr.bf16.mxu0 %v3981_v10 }
 0x696   :  { %2965 = vmatpush1.bf16.msra.mxu1 %v4822_v23  ;;  %v3897_v23 = vld [vmem:[%s5254_s3 + $0x98] ss:$12 sps:$4 sm:$0xff]  }
 0x697   :  { %2966 = vmatprep.subr.bf16.mxu1 %v4832_v26  ;;  %v3898_v26 = vld [vmem:[%s5254_s3 + $0xb0] ss:$12 sps:$4 sm:$0xff]  }
 0x698   :  { %3644 = vmatpush3.bf16.msra.mxu0 %v3893_v15 }
 0x699   :  { %3645 = vmatprep.subr.bf16.mxu0 %v3981_v10 }
 0x69a   :  { %2967 = vmatpush1.bf16.msra.mxu1 %v4838_v27 }
 0x69b   :  { %2968 = vmatprep.subr.bf16.mxu1 %v4848_v30 }
 0x69c   :  { %3646 = vmatpush3.bf16.msra.mxu0 %v3894_v17 }
 0x69d   :  { %3647 = vmatprep.subr.bf16.mxu0 %v3981_v10 }
 0x69e   :  { %2969 = vmatpush1.bf16.msra.mxu1 %v4854_v31 }
 0x69f   :  { %2970 = vmatprep.subr.bf16.mxu1 %v4863_v34 }
 0x6a0   :  { %3648 = vmatpush3.bf16.msra.mxu0 %v3895_v18 }
 0x6a1   :  { %3649 = vmatprep.subr.bf16.mxu0 %v3981_v10 }
 0x6a2   :  { %2971 = vmatpush1.bf16.msra.mxu1 %v4869_v35 }
 0x6a3   :  { %2972 = vmatprep.subr.bf16.mxu1 %v4879_v42  ;;  %v5271_v42 = vsel %vm4548_vm4, %v4644_v44, %v4514_v28  ;;  %v5272_v28 = vsel %vm4556_vm5, %v4562_v48, %v4541_v0 }
 0x6a4   :  { %3650 = vmatpush3.bf16.msra.mxu0 %v3896_v21 }
 0x6a5   :  { %3651 = vmatprep.subr.bf16.mxu0 %v3981_v10 }
 0x6a6   :  { %2973 = vmatpush1.bf16.msra.mxu1 %v4885_v39 }
 0x6a7   :  { %2974 = vmatprep.subr.bf16.mxu1 %v4895_v7 }
 0x6a8   :  { %3652 = vmatpush3.bf16.msra.mxu0 %v3897_v23 }
 0x6a9   :  { %3653 = vmatprep.subr.bf16.mxu0 %v3981_v10 }
 0x6aa   :  { %2975 = vmatpush1.bf16.msra.mxu1 %v4901_v11 }
 0x6ac   :  { %3654 = vmatpush3.bf16.msra.mxu0 %v3898_v26 }
 0x760   :  { %v2719_v27 = vpop.f32.mrb[64].mxu1  ;;  %v2760_v30 = vpop.f32.mrb[40].mxu0 }
 0x761   :  { %v2775_v31 = vadd.f32 %v4656_v50, %v2719_v27  ;;  %v2721_v34 = vpop.f32.mrb[65].mxu1  ;;  %v3637_v35 = vpop.f32.mrb[41].mxu0  ;;  %v2789_v2 = vadd.f32 %v4688_v63, %v2760_v30 }
 0x762   :  { %v2782_v39 = vadd.f32 %v5271_v42, %v2721_v34  ;;  %v2723_v7 = vpop.f32.mrb[66].mxu1  ;;  %v2763_v11 = vpop.f32.mrb[42].mxu0 }
 0x763   :  { %v3338_v29 = vmul.f32 -1.442695, %v2775_v31  ;;  %v2724_v9 = vpop.f32.mrb[67].mxu1  ;;  %v3638_v6 = vpop.f32.mrb[43].mxu0 }
 0x764   :  { %v3339_v10 = vmul.f32 -1.442695, %v2782_v39 }
 0x765   :  { %3959 = vpow2.f32 %v3338_v29 }
 0x766   :  { %3961 = vpow2.f32 %v3339_v10 }
 0x76f   :  { %v3960_v38 = vpop.eup %3959 }
 0x770   :  { %v2779_v60 = vadd.f32 1.0, %v3960_v38  ;;  %v3962_v50 = vpop.eup %3961 }
 0x771   :  { %v2786_v25 = vadd.f32 1.0, %v3962_v50 }
 0x772   :  { %3963 = vrcp.f32 %v2779_v60 }
 0x773   :  { %3965 = vrcp.f32 %v2786_v25 }
 0x77c   :  { %v3964_v54 = vpop.eup %3963 }
 0x77d   :  { %v2790_v59 = vmul.f32 %v3964_v54, %v2789_v2  ;;  %v3966_v53 = vpop.eup %3965 }
 0x77e   :  { %v2793_v4 = vsub.f32 1.0, %v3966_v53  ;;  %v2795_v13 = vmul.f32 %v3966_v53, %v5152_v32 }
 0x77f   :  { %v2791_v44 = vadd.f32 %v2790_v59, %v5272_v28 }
 0x781   :  { %3967 = vtanh.f32 %v2791_v44 }
 0x78b   :  { %v3968_v22 = vpop.eup %3967 }
 0x78c   :  { %v2794_v33 = vmul.f32 %v3968_v22, %v2793_v4 }
 0x78e   :  { %v2796_v37 = vadd.f32 %v2795_v13, %v2794_v33 }
 0x790   :  { %2797 = vst [vmem:[%s5258_s6 + $0x60] sm:$0xff] %v2796_v37  ;;  %2798 = vst [vmem:[%s5258_s6 + $0x18] sm:$0xff] %v2796_v37  ;;  %v2799_v63 = vpack.c.bf16 %v2796_v37, %v2796_v37 }
 0x792   :  { %2993 = vmatmul.mubr.bf16.vlgmr.msra.gmra.mrb[68].mxu1 %v2799_v63  ;;  %3656 = vmatmul.mubr.bf16.vlgmr.msra.gmra.mrb[44].mxu0 %v2799_v63 }
 0x865   :  { %v2994_v0 = vpop.f32.mrb[68].mxu1  ;;  %v3035_v48 = vpop.f32.mrb[44].mxu0 }
 0x866   :  { %v3050_v8 = vadd.f32 %v4675_v45, %v2994_v0  ;;  %v2996_v51 = vpop.f32.mrb[69].mxu1  ;;  %v3657_v55 = vpop.f32.mrb[45].mxu0  ;;  %v3064_v52 = vadd.f32 %v3979_v5, %v3035_v48 }
 0x867   :  { %v3057_v46 = vadd.f32 %v3048_v19, %v2996_v51  ;;  %v2998_v62 = vpop.f32.mrb[70].mxu1  ;;  %v3038_v20 = vpop.f32.mrb[46].mxu0  ;;  %v5273_v19 = vsel %vm4556_vm5, %v4594_v41, %v4536_v40 }
 0x868   :  { %v3364_v24 = vmul.f32 -1.442695, %v3050_v8  ;;  %v2999_v47 = vpop.f32.mrb[71].mxu1  ;;  %v3658_v57 = vpop.f32.mrb[47].mxu0 }
 0x869   :  { %v3365_v3 = vmul.f32 -1.442695, %v3057_v46 }
 0x86a   :  { %3969 = vpow2.f32 %v3364_v24 }
 0x86b   :  { %3971 = vpow2.f32 %v3365_v3 }
 0x874   :  { %v3970_v43 = vpop.eup %3969 }
 0x875   :  { %v3054_v58 = vadd.f32 1.0, %v3970_v43  ;;  %v3972_v45 = vpop.eup %3971 }
 0x876   :  { %v3061_v16 = vadd.f32 1.0, %v3972_v45 }
 0x877   :  { %3973 = vrcp.f32 %v3054_v58 }
 0x878   :  { %3975 = vrcp.f32 %v3061_v16 }
 0x881   :  { %v3974_v12 = vpop.eup %3973 }
 0x882   :  { %v3065_v56 = vmul.f32 %v3974_v12, %v3064_v52  ;;  %v3976_v32 = vpop.eup %3975 }
 0x883   :  { %v3068_v36 = vsub.f32 1.0, %v3976_v32  ;;  %v3070_v15 = vmul.f32 %v3976_v32, %v2796_v37 }
 0x884   :  { %v3066_v49 = vadd.f32 %v3065_v56, %v5273_v19 }
 0x886   :  { %3977 = vtanh.f32 %v3066_v49 }
 0x890   :  { %v3978_v1 = vpop.eup %3977 }
 0x891   :  { %v3069_v61 = vmul.f32 %v3978_v1, %v3068_v36 }
 0x893   :  { %v3071_v17 = vadd.f32 %v3070_v15, %v3069_v61 }
 0x895   :  { %3072 = vst [vmem:[%s5258_s6 + $0x70] sm:$0xff] %v3071_v17  ;;  %3073 = vst [vmem:[%s5258_s6 + $0x8] sm:$0xff] %v3071_v17 }

</bundles_post_ra>
